<compile_context>
chip_gen: v5e
topology: v5e:2x2
jax: 0.10.0
libtpu: 0.0.40
codegen_flags: <defaults>
</compile_context>

<pallas_src>
import math
from functools import partial

import jax
import jax.numpy as jnp
from jax import lax
from jax.experimental import pallas as pl
from jax.experimental.pallas import tpu as pltpu

# ---------------- small deterministic config (matches the module defaults) ----------------
DIM = 32
N_HEADS = 4
N_KV_HEADS = 2
HEAD_DIM = DIM // N_HEADS
MULTIPLE_OF = 32
_H = int(2 * (4 * DIM) / 3)
HIDDEN_DIM = MULTIPLE_OF * ((_H + MULTIPLE_OF - 1) // MULTIPLE_OF)   # 96
EPS = 1e-6
DROPOUT = 0.0     # all Dropout layers are identity at p=0.0
BATCH = 2
SEQ = 8
ROPE_THETA = 10000.0

# dot_general dimension numbers for "A @ B^T" (PyTorch (out, in) weight layout, no transposes)
_CT = (((1,), (1,)), ((), ()))


# ---------------- fused whole-layer kernel ----------------
def _llama_layer_kernel(x_ref, anw_ref, wqkv_ref, wswap_ref, cos_ref, sin_ref,
                        wo_ref, fnw_ref, w1_ref, w3_ref, w2_ref, o_ref, attn_ref,
                        *, n_heads, n_kv_heads, head_dim, seq_len, eps, scale):
    f32 = jnp.float32
    x = x_ref[...].astype(f32)                                       # (rows, D)
    rows = x.shape[0]
    n_seq = rows // seq_len                                          # sequences in this slab
    q_dim = n_heads * head_dim
    kv_dim = n_kv_heads * head_dim
    n_rep = n_heads // n_kv_heads

    # ---- RMSNorm (attention): x / (sqrt(mean(x^2)) + eps) * w (eps outside sqrt, as in module) ----
    rms = jnp.sqrt(jnp.mean(x * x, axis=-1, keepdims=True))
    xn = x * pl.reciprocal(rms + eps, approx=True) * anw_ref[...]

    # ---- fused token-major QKV projection; RoPE via pair-swap folded into wswap ----
    qkv = lax.dot_general(xn, wqkv_ref[...], _CT, preferred_element_type=f32)   # (rows, 64)
    swp = lax.dot_general(xn, wswap_ref[...], _CT, preferred_element_type=f32)  # pair-swapped qkv
    # v columns have cos=1 / sin=0, so they pass through unchanged.
    qkv = qkv * cos_ref[...] + swp * sin_ref[...]

    # ---- attention, unrolled over (sequence, head); GQA = index the shared kv head ----
    for b in range(n_seq):
        r0 = b * seq_len
        for h in range(n_heads):
            g = h // n_rep
            q_h = qkv[r0:r0 + seq_len, h * head_dim:(h + 1) * head_dim]                   # (S, hd)
            k_h = qkv[r0:r0 + seq_len, q_dim + g * head_dim:q_dim + (g + 1) * head_dim]   # (S, hd)
            v_h = qkv[r0:r0 + seq_len,
                      q_dim + kv_dim + g * head_dim:q_dim + kv_dim + (g + 1) * head_dim]  # (S, hd)
            s = lax.dot_general(q_h, k_h, _CT, preferred_element_type=f32) * scale        # (S, S)
            s = s - jnp.max(s, axis=-1, keepdims=True)
            p = jnp.exp(s)
            p = p * pl.reciprocal(jnp.sum(p, axis=-1, keepdims=True), approx=True)
            # TODO(synk): attn_dropout is identity (dropout=0.0); stochastic dropout not emitted.
            attn_ref[r0:r0 + seq_len, h * head_dim:(h + 1) * head_dim] = (
                jnp.dot(p, v_h, preferred_element_type=f32))

    attn = lax.dot_general(attn_ref[...], wo_ref[...], _CT, preferred_element_type=f32)   # (rows, D)
    res = x + attn

    # ---- RMSNorm (ffn) + SwiGLU + W2 + residual ----
    rms2 = jnp.sqrt(jnp.mean(res * res, axis=-1, keepdims=True))
    xn2 = res * pl.reciprocal(rms2 + eps, approx=True) * fnw_ref[...]
    a = lax.dot_general(xn2, w1_ref[...], _CT, preferred_element_type=f32)                # (rows, H)
    g3 = lax.dot_general(xn2, w3_ref[...], _CT, preferred_element_type=f32)               # (rows, H)
    hsw = a * jax.nn.sigmoid(a) * g3                                                      # silu(w1 x)*w3 x
    ffn = lax.dot_general(hsw, w2_ref[...], _CT, preferred_element_type=f32)              # (rows, D)

    o_ref[...] = (res + ffn).astype(o_ref.dtype)


# ---------------- RoPE tables, token-major: (S, qkv_dim) ----------------
def _rope_tables(seq_len, head_dim, n_heads, n_kv_heads, theta=ROPE_THETA):
    hd2 = head_dim // 2
    freqs = 1.0 / (theta ** (jnp.arange(0, head_dim, 2, dtype=jnp.float32)[:hd2] / head_dim))
    ang = jnp.outer(jnp.arange(seq_len, dtype=jnp.float32), freqs)          # (S, hd/2)
    cos_h = jnp.repeat(jnp.cos(ang), 2, axis=1)                             # cols [c0,c0,c1,c1,...]
    sin_h = jnp.stack([-jnp.sin(ang), jnp.sin(ang)], axis=2).reshape(seq_len, head_dim)
    v_cols = n_kv_heads * head_dim
    cos_t = jnp.concatenate([jnp.tile(cos_h, (1, n_heads)),
                             jnp.tile(cos_h, (1, n_kv_heads)),
                             jnp.ones((seq_len, v_cols), jnp.float32)], axis=1)
    sin_t = jnp.concatenate([jnp.tile(sin_h, (1, n_heads)),
                             jnp.tile(sin_h, (1, n_kv_heads)),
                             jnp.zeros((seq_len, v_cols), jnp.float32)], axis=1)
    return cos_t, sin_t


def _tensorcores_per_chip():
    try:
        kind = jax.devices()[0].device_kind.lower()
    except Exception:
        return 1
    return 2 if "v7" in kind else 1


_NUM_TC = _tensorcores_per_chip()


# ---------------- wrapper ----------------
@jax.jit
def llama_layer(p, x):
    B, S, D = x.shape
    q_dim = N_HEADS * HEAD_DIM
    kv_dim = N_KV_HEADS * HEAD_DIM
    qkv_dim = q_dim + 2 * kv_dim

    wqkv = jnp.concatenate([p["wq"], p["wk"], p["wv"]], axis=0)             # (qkv_dim, D)
    # RoPE pair-swap folded into the weights: row m of wswap is row m^1 of wqkv.
    wswap = wqkv[jnp.arange(qkv_dim) ^ 1]
    cos_t, sin_t = _rope_tables(S, HEAD_DIM, N_HEADS, N_KV_HEADS)           # (S, qkv_dim)

    fold_batch = (_NUM_TC == 1) or (B == 1)
    if fold_batch:
        # single TensorCore (v5e/v6e): one grid step over the whole (B*S, D) slab
        n_seq, rows, grid = B, B * S, (1,)
        x_in = x.reshape(B * S, D)
        x_spec = pl.BlockSpec((B * S, D), lambda i: (0, 0))
        out_spec = pl.BlockSpec((B * S, D), lambda i: (0, 0))
        out_shape = jax.ShapeDtypeStruct((B * S, D), x.dtype)
        dims = ("arbitrary",)
    else:
        # v7x (2 TCs/chip): keep batch as a parallel grid axis so both cores get work
        n_seq, rows, grid = 1, S, (B,)
        x_in = x
        x_spec = pl.BlockSpec((None, S, D), lambda b: (b, 0, 0))
        out_spec = pl.BlockSpec((None, S, D), lambda b: (b, 0, 0))
        out_shape = jax.ShapeDtypeStruct((B, S, D), x.dtype)
        dims = ("parallel",)

    cos_t = jnp.tile(cos_t, (n_seq, 1))                                     # (rows, qkv_dim)
    sin_t = jnp.tile(sin_t, (n_seq, 1))

    def full2d(shape):
        return pl.BlockSpec(shape, lambda i: (0, 0))

    kernel = partial(_llama_layer_kernel,
                     n_heads=N_HEADS, n_kv_heads=N_KV_HEADS, head_dim=HEAD_DIM,
                     seq_len=S, eps=EPS, scale=1.0 / math.sqrt(HEAD_DIM))

    out = pl.pallas_call(
        kernel,
        out_shape=out_shape,
        grid=grid,
        in_specs=[
            x_spec,                                # x slab
            full2d((1, D)),                        # attention_norm weight
            full2d((qkv_dim, D)),                  # fused [wq; wk; wv]
            full2d((qkv_dim, D)),                  # pair-swapped fused weights (RoPE swap folded in)
            full2d((rows, qkv_dim)),               # RoPE cos table (token-major)
            full2d((rows, qkv_dim)),               # RoPE (+-)sin table (token-major)
            full2d((D, q_dim)),                    # wo
            full2d((1, D)),                        # ffn_norm weight
            full2d((HIDDEN_DIM, D)),               # w1
            full2d((HIDDEN_DIM, D)),               # w3
            full2d((D, HIDDEN_DIM)),               # w2
        ],
        out_specs=out_spec,
        scratch_shapes=[pltpu.VMEM((rows, q_dim), jnp.float32)],   # per-head output slab
        compiler_params=pltpu.CompilerParams(dimension_semantics=dims),
    )(x_in, p["attn_norm"].reshape(1, D), wqkv, wswap, cos_t, sin_t,
      p["wo"], p["ffn_norm"].reshape(1, D), p["w1"], p["w3"], p["w2"])

    return out.reshape(B, S, D)


# ---------------- params (PyTorch layouts, unchanged) ----------------
def init_params(key):
    ks = jax.random.split(key, 7)

    def w(k, shape):
        return 0.02 * jax.random.normal(k, shape, jnp.float32)

    return dict(
        wq=w(ks[0], (N_HEADS * HEAD_DIM, DIM)),
        wk=w(ks[1], (N_KV_HEADS * HEAD_DIM, DIM)),
        wv=w(ks[2], (N_KV_HEADS * HEAD_DIM, DIM)),
        wo=w(ks[3], (DIM, N_HEADS * HEAD_DIM)),
        w1=w(ks[4], (HIDDEN_DIM, DIM)),
        w2=w(ks[5], (DIM, HIDDEN_DIM)),
        w3=w(ks[6], (HIDDEN_DIM, DIM)),
        attn_norm=jnp.ones((DIM,), jnp.float32),
        ffn_norm=jnp.ones((DIM,), jnp.float32),
    )


# ---------------- pure-JAX reference (mirrors the PyTorch module) ----------------
def llama_layer_ref(p, x):
    B, S, D = x.shape
    hi = lax.Precision.HIGHEST

    def rmsnorm(v, w):
        r = jnp.sqrt(jnp.mean(v * v, axis=-1, keepdims=True))
        return v / (r + EPS) * w

    ln1 = rmsnorm(x, p["attn_norm"])
    q = jnp.einsum('bsd,nd->bsn', ln1, p["wq"], precision=hi).reshape(B, S, N_HEADS, HEAD_DIM)
    k = jnp.einsum('bsd,nd->bsn', ln1, p["wk"], precision=hi).reshape(B, S, N_KV_HEADS, HEAD_DIM)
    v = jnp.einsum('bsd,nd->bsn', ln1, p["wv"], precision=hi).reshape(B, S, N_KV_HEADS, HEAD_DIM)

    hd2 = HEAD_DIM // 2
    freqs = 1.0 / (ROPE_THETA ** (jnp.arange(0, HEAD_DIM, 2, dtype=jnp.float32)[:hd2] / HEAD_DIM))
    ang = jnp.outer(jnp.arange(S, dtype=jnp.float32), freqs)
    c, s_ = jnp.cos(ang), jnp.sin(ang)

    def rope(t):
        tr, ti = t[..., 0::2], t[..., 1::2]
        cb, sb = c[None, :, None, :], s_[None, :, None, :]
        return jnp.stack([tr * cb - ti * sb, tr * sb + ti * cb], axis=-1).reshape(t.shape)

    q, k = rope(q), rope(k)
    n_rep = N_HEADS // N_KV_HEADS
    k = jnp.repeat(k, n_rep, axis=2)
    v = jnp.repeat(v, n_rep, axis=2)
    q, k, v = (t.transpose(0, 2, 1, 3) for t in (q, k, v))
    sc = jnp.einsum('bhqd,bhkd->bhqk', q, k, precision=hi) / math.sqrt(HEAD_DIM)
    pr = jax.nn.softmax(sc, axis=-1)
    o = jnp.einsum('bhqk,bhkd->bhqd', pr, v, precision=hi)
    o = o.transpose(0, 2, 1, 3).reshape(B, S, D)
    attn = jnp.einsum('bsn,dn->bsd', o, p["wo"], precision=hi)
    res = x + attn
    ln2 = rmsnorm(res, p["ffn_norm"])
    a = jnp.einsum('bsd,hd->bsh', ln2, p["w1"], precision=hi)
    g = jnp.einsum('bsd,hd->bsh', ln2, p["w3"], precision=hi)
    hsw = a * jax.nn.sigmoid(a) * g
    ffn = jnp.einsum('bsh,dh->bsd', hsw, p["w2"], precision=hi)
    return res + ffn


if __name__ == "__main__":
    key = jax.random.PRNGKey(0)
    pkey, xkey = jax.random.split(key)
    params = init_params(pkey)
    x = jax.random.normal(xkey, (BATCH, SEQ, DIM), jnp.float32)

    out = jax.block_until_ready(llama_layer(params, x))
    ref = llama_layer_ref(params, x)

    assert out.shape == (BATCH, SEQ, DIM) and out.dtype == jnp.float32
    assert bool(jnp.all(jnp.isfinite(out)))
    assert bool(jnp.allclose(out, ref, atol=2e-3, rtol=2e-3)), float(jnp.max(jnp.abs(out - ref)))
    print("KERNEL_OK")
</pallas_src>

<mosaic_0001>
module attributes {stable_mosaic.version = 11 : i64} {
  func.func @_llama_layer_kernel(%arg0: i32, %arg1: memref<16x32xf32, #tpu.memory_space<vmem>>, %arg2: memref<1x32xf32, #tpu.memory_space<vmem>>, %arg3: memref<64x32xf32, #tpu.memory_space<vmem>>, %arg4: memref<64x32xf32, #tpu.memory_space<vmem>>, %arg5: memref<16x64xf32, #tpu.memory_space<vmem>>, %arg6: memref<16x64xf32, #tpu.memory_space<vmem>>, %arg7: memref<32x32xf32, #tpu.memory_space<vmem>>, %arg8: memref<1x32xf32, #tpu.memory_space<vmem>>, %arg9: memref<96x32xf32, #tpu.memory_space<vmem>>, %arg10: memref<96x32xf32, #tpu.memory_space<vmem>>, %arg11: memref<32x96xf32, #tpu.memory_space<vmem>>, %arg12: memref<16x32xf32, #tpu.memory_space<vmem>>, %arg13: memref<16x32xf32, #tpu.memory_space<vmem>>) attributes {dimension_semantics = [#tpu.dimension_semantics<arbitrary>], iteration_bounds = array<i64: 1>, scalar_prefetch = 0 : i64, scratch_operands = 1 : i64, tpu.core_type = #tpu.core_type<tc>, window_params = [{pipeline_mode = #tpu.pipeline_mode<synchronous>, transform_indices = @transform_0, window_bounds = array<i64: 16, 32>}, {pipeline_mode = #tpu.pipeline_mode<synchronous>, transform_indices = @transform_1, window_bounds = array<i64: 1, 32>}, {pipeline_mode = #tpu.pipeline_mode<synchronous>, transform_indices = @transform_2, window_bounds = array<i64: 64, 32>}, {pipeline_mode = #tpu.pipeline_mode<synchronous>, transform_indices = @transform_3, window_bounds = array<i64: 64, 32>}, {pipeline_mode = #tpu.pipeline_mode<synchronous>, transform_indices = @transform_4, window_bounds = array<i64: 16, 64>}, {pipeline_mode = #tpu.pipeline_mode<synchronous>, transform_indices = @transform_5, window_bounds = array<i64: 16, 64>}, {pipeline_mode = #tpu.pipeline_mode<synchronous>, transform_indices = @transform_6, window_bounds = array<i64: 32, 32>}, {pipeline_mode = #tpu.pipeline_mode<synchronous>, transform_indices = @transform_7, window_bounds = array<i64: 1, 32>}, {pipeline_mode = #tpu.pipeline_mode<synchronous>, transform_indices = @transform_8, window_bounds = array<i64: 96, 32>}, {pipeline_mode = #tpu.pipeline_mode<synchronous>, transform_indices = @transform_9, window_bounds = array<i64: 96, 32>}, {pipeline_mode = #tpu.pipeline_mode<synchronous>, transform_indices = @transform_10, window_bounds = array<i64: 32, 96>}, {pipeline_mode = #tpu.pipeline_mode<synchronous>, transform_indices = @transform_11, window_bounds = array<i64: 16, 32>}]} {
    %c0 = arith.constant 0 : index
    %c0_0 = arith.constant 0 : index
    %0 = vector.load %arg1[%c0, %c0_0] : memref<16x32xf32, #tpu.memory_space<vmem>>, vector<16x32xf32>
    %1 = arith.mulf %0, %0 : vector<16x32xf32>
    %cst = arith.constant dense<0.000000e+00> : vector<16xf32>
    %2 = vector.multi_reduction <add>, %1, %cst [1] : vector<16x32xf32> to vector<16xf32>
    %3 = vector.shape_cast %2 : vector<16xf32> to vector<16x1xf32>
    %cst_1 = arith.constant 3.200000e+01 : f32
    %4 = vector.broadcast %cst_1 : f32 to vector<16x1xf32>
    %5 = arith.divf %3, %4 : vector<16x1xf32>
    %6 = math.sqrt %5 : vector<16x1xf32>
    %cst_2 = arith.constant 9.99999997E-7 : f32
    %7 = vector.broadcast %cst_2 : f32 to vector<16x1xf32>
    %8 = arith.addf %6, %7 : vector<16x1xf32>
    %9 = tpu.reciprocal %8 {approx = true} : vector<16x1xf32> -> vector<16x1xf32>
    %10 = vector.broadcast %9 : vector<16x1xf32> to vector<16x32xf32>
    %11 = arith.mulf %0, %10 : vector<16x32xf32>
    %c0_3 = arith.constant 0 : index
    %c0_4 = arith.constant 0 : index
    %12 = vector.load %arg2[%c0_3, %c0_4] : memref<1x32xf32, #tpu.memory_space<vmem>>, vector<1x32xf32>
    %13 = vector.broadcast %12 : vector<1x32xf32> to vector<16x32xf32>
    %14 = arith.mulf %11, %13 : vector<16x32xf32>
    %c0_5 = arith.constant 0 : index
    %c0_6 = arith.constant 0 : index
    %15 = vector.load %arg3[%c0_5, %c0_6] : memref<64x32xf32, #tpu.memory_space<vmem>>, vector<64x32xf32>
    %cst_7 = arith.constant dense<0.000000e+00> : vector<16x64xf32>
    %16 = tpu.matmul %14, %15, %cst_7 {dimension_numbers = #tpu.dot_dimension_numbers<[1], [1], [0], [0], [0, 0, 1, 0], [], []>} : vector<16x32xf32>, vector<64x32xf32>, vector<16x64xf32> -> vector<16x64xf32>
    %c0_8 = arith.constant 0 : index
    %c0_9 = arith.constant 0 : index
    %17 = vector.load %arg4[%c0_8, %c0_9] : memref<64x32xf32, #tpu.memory_space<vmem>>, vector<64x32xf32>
    %cst_10 = arith.constant dense<0.000000e+00> : vector<16x64xf32>
    %18 = tpu.matmul %14, %17, %cst_10 {dimension_numbers = #tpu.dot_dimension_numbers<[1], [1], [0], [0], [0, 0, 1, 0], [], []>} : vector<16x32xf32>, vector<64x32xf32>, vector<16x64xf32> -> vector<16x64xf32>
    %c0_11 = arith.constant 0 : index
    %c0_12 = arith.constant 0 : index
    %19 = vector.load %arg5[%c0_11, %c0_12] : memref<16x64xf32, #tpu.memory_space<vmem>>, vector<16x64xf32>
    %20 = arith.mulf %16, %19 : vector<16x64xf32>
    %c0_13 = arith.constant 0 : index
    %c0_14 = arith.constant 0 : index
    %21 = vector.load %arg6[%c0_13, %c0_14] : memref<16x64xf32, #tpu.memory_space<vmem>>, vector<16x64xf32>
    %22 = arith.mulf %18, %21 : vector<16x64xf32>
    %23 = arith.addf %20, %22 : vector<16x64xf32>
    %24 = vector.extract_strided_slice %23 {offsets = [0, 0], sizes = [8, 8], strides = [1, 1]} : vector<16x64xf32> to vector<8x8xf32>
    %25 = vector.extract_strided_slice %23 {offsets = [0, 32], sizes = [8, 8], strides = [1, 1]} : vector<16x64xf32> to vector<8x8xf32>
    %26 = vector.extract_strided_slice %23 {offsets = [0, 48], sizes = [8, 8], strides = [1, 1]} : vector<16x64xf32> to vector<8x8xf32>
    %cst_15 = arith.constant dense<0.000000e+00> : vector<8x8xf32>
    %27 = tpu.matmul %24, %25, %cst_15 {dimension_numbers = #tpu.dot_dimension_numbers<[1], [1], [0], [0], [0, 0, 1, 0], [], []>} : vector<8x8xf32>, vector<8x8xf32>, vector<8x8xf32> -> vector<8x8xf32>
    %cst_16 = arith.constant 0.353553385 : f32
    %28 = vector.broadcast %cst_16 : f32 to vector<8x8xf32>
    %29 = arith.mulf %27, %28 : vector<8x8xf32>
    %cst_17 = arith.constant dense<0xFF800000> : vector<8xf32>
    %30 = vector.multi_reduction <maximumf>, %29, %cst_17 [1] : vector<8x8xf32> to vector<8xf32>
    %31 = vector.shape_cast %30 : vector<8xf32> to vector<8x1xf32>
    %32 = vector.broadcast %31 : vector<8x1xf32> to vector<8x8xf32>
    %33 = arith.subf %29, %32 : vector<8x8xf32>
    %34 = math.exp %33 : vector<8x8xf32>
    %cst_18 = arith.constant dense<0.000000e+00> : vector<8xf32>
    %35 = vector.multi_reduction <add>, %34, %cst_18 [1] : vector<8x8xf32> to vector<8xf32>
    %36 = vector.shape_cast %35 : vector<8xf32> to vector<8x1xf32>
    %37 = tpu.reciprocal %36 {approx = true} : vector<8x1xf32> -> vector<8x1xf32>
    %38 = vector.broadcast %37 : vector<8x1xf32> to vector<8x8xf32>
    %39 = arith.mulf %34, %38 : vector<8x8xf32>
    %cst_19 = arith.constant dense<0.000000e+00> : vector<8x8xf32>
    %40 = tpu.matmul %39, %26, %cst_19 {dimension_numbers = #tpu.dot_dimension_numbers<[1], [0], [0], [1], [0, 0, 1, 1], [], []>} : vector<8x8xf32>, vector<8x8xf32>, vector<8x8xf32> -> vector<8x8xf32>
    %c0_20 = arith.constant 0 : index
    %c0_21 = arith.constant 0 : index
    %41 = vector.load %arg13[%c0_20, %c0_21] : memref<16x32xf32, #tpu.memory_space<vmem>>, vector<8x8xf32>
    tpu.vector_store %arg13[%c0_20, %c0_21], %40 {strides = array<i32>} : memref<16x32xf32, #tpu.memory_space<vmem>>, vector<8x8xf32>,
    %42 = vector.extract_strided_slice %23 {offsets = [0, 8], sizes = [8, 8], strides = [1, 1]} : vector<16x64xf32> to vector<8x8xf32>
    %43 = vector.extract_strided_slice %23 {offsets = [0, 32], sizes = [8, 8], strides = [1, 1]} : vector<16x64xf32> to vector<8x8xf32>
    %44 = vector.extract_strided_slice %23 {offsets = [0, 48], sizes = [8, 8], strides = [1, 1]} : vector<16x64xf32> to vector<8x8xf32>
    %cst_22 = arith.constant dense<0.000000e+00> : vector<8x8xf32>
    %45 = tpu.matmul %42, %43, %cst_22 {dimension_numbers = #tpu.dot_dimension_numbers<[1], [1], [0], [0], [0, 0, 1, 0], [], []>} : vector<8x8xf32>, vector<8x8xf32>, vector<8x8xf32> -> vector<8x8xf32>
    %cst_23 = arith.constant 0.353553385 : f32
    %46 = vector.broadcast %cst_23 : f32 to vector<8x8xf32>
    %47 = arith.mulf %45, %46 : vector<8x8xf32>
    %cst_24 = arith.constant dense<0xFF800000> : vector<8xf32>
    %48 = vector.multi_reduction <maximumf>, %47, %cst_24 [1] : vector<8x8xf32> to vector<8xf32>
    %49 = vector.shape_cast %48 : vector<8xf32> to vector<8x1xf32>
    %50 = vector.broadcast %49 : vector<8x1xf32> to vector<8x8xf32>
    %51 = arith.subf %47, %50 : vector<8x8xf32>
    %52 = math.exp %51 : vector<8x8xf32>
    %cst_25 = arith.constant dense<0.000000e+00> : vector<8xf32>
    %53 = vector.multi_reduction <add>, %52, %cst_25 [1] : vector<8x8xf32> to vector<8xf32>
    %54 = vector.shape_cast %53 : vector<8xf32> to vector<8x1xf32>
    %55 = tpu.reciprocal %54 {approx = true} : vector<8x1xf32> -> vector<8x1xf32>
    %56 = vector.broadcast %55 : vector<8x1xf32> to vector<8x8xf32>
    %57 = arith.mulf %52, %56 : vector<8x8xf32>
    %cst_26 = arith.constant dense<0.000000e+00> : vector<8x8xf32>
    %58 = tpu.matmul %57, %44, %cst_26 {dimension_numbers = #tpu.dot_dimension_numbers<[1], [0], [0], [1], [0, 0, 1, 1], [], []>} : vector<8x8xf32>, vector<8x8xf32>, vector<8x8xf32> -> vector<8x8xf32>
    %c0_27 = arith.constant 0 : index
    %c8 = arith.constant 8 : index
    %59 = vector.load %arg13[%c0_27, %c8] : memref<16x32xf32, #tpu.memory_space<vmem>>, vector<8x8xf32>
    tpu.vector_store %arg13[%c0_27, %c8], %58 {strides = array<i32>} : memref<16x32xf32, #tpu.memory_space<vmem>>, vector<8x8xf32>,
    %60 = vector.extract_strided_slice %23 {offsets = [0, 16], sizes = [8, 8], strides = [1, 1]} : vector<16x64xf32> to vector<8x8xf32>
    %61 = vector.extract_strided_slice %23 {offsets = [0, 40], sizes = [8, 8], strides = [1, 1]} : vector<16x64xf32> to vector<8x8xf32>
    %62 = vector.extract_strided_slice %23 {offsets = [0, 56], sizes = [8, 8], strides = [1, 1]} : vector<16x64xf32> to vector<8x8xf32>
    %cst_28 = arith.constant dense<0.000000e+00> : vector<8x8xf32>
    %63 = tpu.matmul %60, %61, %cst_28 {dimension_numbers = #tpu.dot_dimension_numbers<[1], [1], [0], [0], [0, 0, 1, 0], [], []>} : vector<8x8xf32>, vector<8x8xf32>, vector<8x8xf32> -> vector<8x8xf32>
    %cst_29 = arith.constant 0.353553385 : f32
    %64 = vector.broadcast %cst_29 : f32 to vector<8x8xf32>
    %65 = arith.mulf %63, %64 : vector<8x8xf32>
    %cst_30 = arith.constant dense<0xFF800000> : vector<8xf32>
    %66 = vector.multi_reduction <maximumf>, %65, %cst_30 [1] : vector<8x8xf32> to vector<8xf32>
    %67 = vector.shape_cast %66 : vector<8xf32> to vector<8x1xf32>
    %68 = vector.broadcast %67 : vector<8x1xf32> to vector<8x8xf32>
    %69 = arith.subf %65, %68 : vector<8x8xf32>
    %70 = math.exp %69 : vector<8x8xf32>
    %cst_31 = arith.constant dense<0.000000e+00> : vector<8xf32>
    %71 = vector.multi_reduction <add>, %70, %cst_31 [1] : vector<8x8xf32> to vector<8xf32>
    %72 = vector.shape_cast %71 : vector<8xf32> to vector<8x1xf32>
    %73 = tpu.reciprocal %72 {approx = true} : vector<8x1xf32> -> vector<8x1xf32>
    %74 = vector.broadcast %73 : vector<8x1xf32> to vector<8x8xf32>
    %75 = arith.mulf %70, %74 : vector<8x8xf32>
    %cst_32 = arith.constant dense<0.000000e+00> : vector<8x8xf32>
    %76 = tpu.matmul %75, %62, %cst_32 {dimension_numbers = #tpu.dot_dimension_numbers<[1], [0], [0], [1], [0, 0, 1, 1], [], []>} : vector<8x8xf32>, vector<8x8xf32>, vector<8x8xf32> -> vector<8x8xf32>
    %c0_33 = arith.constant 0 : index
    %c16 = arith.constant 16 : index
    %77 = vector.load %arg13[%c0_33, %c16] : memref<16x32xf32, #tpu.memory_space<vmem>>, vector<8x8xf32>
    tpu.vector_store %arg13[%c0_33, %c16], %76 {strides = array<i32>} : memref<16x32xf32, #tpu.memory_space<vmem>>, vector<8x8xf32>,
    %78 = vector.extract_strided_slice %23 {offsets = [0, 24], sizes = [8, 8], strides = [1, 1]} : vector<16x64xf32> to vector<8x8xf32>
    %79 = vector.extract_strided_slice %23 {offsets = [0, 40], sizes = [8, 8], strides = [1, 1]} : vector<16x64xf32> to vector<8x8xf32>
    %80 = vector.extract_strided_slice %23 {offsets = [0, 56], sizes = [8, 8], strides = [1, 1]} : vector<16x64xf32> to vector<8x8xf32>
    %cst_34 = arith.constant dense<0.000000e+00> : vector<8x8xf32>
    %81 = tpu.matmul %78, %79, %cst_34 {dimension_numbers = #tpu.dot_dimension_numbers<[1], [1], [0], [0], [0, 0, 1, 0], [], []>} : vector<8x8xf32>, vector<8x8xf32>, vector<8x8xf32> -> vector<8x8xf32>
    %cst_35 = arith.constant 0.353553385 : f32
    %82 = vector.broadcast %cst_35 : f32 to vector<8x8xf32>
    %83 = arith.mulf %81, %82 : vector<8x8xf32>
    %cst_36 = arith.constant dense<0xFF800000> : vector<8xf32>
    %84 = vector.multi_reduction <maximumf>, %83, %cst_36 [1] : vector<8x8xf32> to vector<8xf32>
    %85 = vector.shape_cast %84 : vector<8xf32> to vector<8x1xf32>
    %86 = vector.broadcast %85 : vector<8x1xf32> to vector<8x8xf32>
    %87 = arith.subf %83, %86 : vector<8x8xf32>
    %88 = math.exp %87 : vector<8x8xf32>
    %cst_37 = arith.constant dense<0.000000e+00> : vector<8xf32>
    %89 = vector.multi_reduction <add>, %88, %cst_37 [1] : vector<8x8xf32> to vector<8xf32>
    %90 = vector.shape_cast %89 : vector<8xf32> to vector<8x1xf32>
    %91 = tpu.reciprocal %90 {approx = true} : vector<8x1xf32> -> vector<8x1xf32>
    %92 = vector.broadcast %91 : vector<8x1xf32> to vector<8x8xf32>
    %93 = arith.mulf %88, %92 : vector<8x8xf32>
    %cst_38 = arith.constant dense<0.000000e+00> : vector<8x8xf32>
    %94 = tpu.matmul %93, %80, %cst_38 {dimension_numbers = #tpu.dot_dimension_numbers<[1], [0], [0], [1], [0, 0, 1, 1], [], []>} : vector<8x8xf32>, vector<8x8xf32>, vector<8x8xf32> -> vector<8x8xf32>
    %c0_39 = arith.constant 0 : index
    %c24 = arith.constant 24 : index
    %95 = vector.load %arg13[%c0_39, %c24] : memref<16x32xf32, #tpu.memory_space<vmem>>, vector<8x8xf32>
    tpu.vector_store %arg13[%c0_39, %c24], %94 {strides = array<i32>} : memref<16x32xf32, #tpu.memory_space<vmem>>, vector<8x8xf32>,
    %96 = vector.extract_strided_slice %23 {offsets = [8, 0], sizes = [8, 8], strides = [1, 1]} : vector<16x64xf32> to vector<8x8xf32>
    %97 = vector.extract_strided_slice %23 {offsets = [8, 32], sizes = [8, 8], strides = [1, 1]} : vector<16x64xf32> to vector<8x8xf32>
    %98 = vector.extract_strided_slice %23 {offsets = [8, 48], sizes = [8, 8], strides = [1, 1]} : vector<16x64xf32> to vector<8x8xf32>
    %cst_40 = arith.constant dense<0.000000e+00> : vector<8x8xf32>
    %99 = tpu.matmul %96, %97, %cst_40 {dimension_numbers = #tpu.dot_dimension_numbers<[1], [1], [0], [0], [0, 0, 1, 0], [], []>} : vector<8x8xf32>, vector<8x8xf32>, vector<8x8xf32> -> vector<8x8xf32>
    %cst_41 = arith.constant 0.353553385 : f32
    %100 = vector.broadcast %cst_41 : f32 to vector<8x8xf32>
    %101 = arith.mulf %99, %100 : vector<8x8xf32>
    %cst_42 = arith.constant dense<0xFF800000> : vector<8xf32>
    %102 = vector.multi_reduction <maximumf>, %101, %cst_42 [1] : vector<8x8xf32> to vector<8xf32>
    %103 = vector.shape_cast %102 : vector<8xf32> to vector<8x1xf32>
    %104 = vector.broadcast %103 : vector<8x1xf32> to vector<8x8xf32>
    %105 = arith.subf %101, %104 : vector<8x8xf32>
    %106 = math.exp %105 : vector<8x8xf32>
    %cst_43 = arith.constant dense<0.000000e+00> : vector<8xf32>
    %107 = vector.multi_reduction <add>, %106, %cst_43 [1] : vector<8x8xf32> to vector<8xf32>
    %108 = vector.shape_cast %107 : vector<8xf32> to vector<8x1xf32>
    %109 = tpu.reciprocal %108 {approx = true} : vector<8x1xf32> -> vector<8x1xf32>
    %110 = vector.broadcast %109 : vector<8x1xf32> to vector<8x8xf32>
    %111 = arith.mulf %106, %110 : vector<8x8xf32>
    %cst_44 = arith.constant dense<0.000000e+00> : vector<8x8xf32>
    %112 = tpu.matmul %111, %98, %cst_44 {dimension_numbers = #tpu.dot_dimension_numbers<[1], [0], [0], [1], [0, 0, 1, 1], [], []>} : vector<8x8xf32>, vector<8x8xf32>, vector<8x8xf32> -> vector<8x8xf32>
    %c8_45 = arith.constant 8 : index
    %c0_46 = arith.constant 0 : index
    %113 = vector.load %arg13[%c8_45, %c0_46] : memref<16x32xf32, #tpu.memory_space<vmem>>, vector<8x8xf32>
    tpu.vector_store %arg13[%c8_45, %c0_46], %112 {strides = array<i32>} : memref<16x32xf32, #tpu.memory_space<vmem>>, vector<8x8xf32>,
    %114 = vector.extract_strided_slice %23 {offsets = [8, 8], sizes = [8, 8], strides = [1, 1]} : vector<16x64xf32> to vector<8x8xf32>
    %115 = vector.extract_strided_slice %23 {offsets = [8, 32], sizes = [8, 8], strides = [1, 1]} : vector<16x64xf32> to vector<8x8xf32>
    %116 = vector.extract_strided_slice %23 {offsets = [8, 48], sizes = [8, 8], strides = [1, 1]} : vector<16x64xf32> to vector<8x8xf32>
    %cst_47 = arith.constant dense<0.000000e+00> : vector<8x8xf32>
    %117 = tpu.matmul %114, %115, %cst_47 {dimension_numbers = #tpu.dot_dimension_numbers<[1], [1], [0], [0], [0, 0, 1, 0], [], []>} : vector<8x8xf32>, vector<8x8xf32>, vector<8x8xf32> -> vector<8x8xf32>
    %cst_48 = arith.constant 0.353553385 : f32
    %118 = vector.broadcast %cst_48 : f32 to vector<8x8xf32>
    %119 = arith.mulf %117, %118 : vector<8x8xf32>
    %cst_49 = arith.constant dense<0xFF800000> : vector<8xf32>
    %120 = vector.multi_reduction <maximumf>, %119, %cst_49 [1] : vector<8x8xf32> to vector<8xf32>
    %121 = vector.shape_cast %120 : vector<8xf32> to vector<8x1xf32>
    %122 = vector.broadcast %121 : vector<8x1xf32> to vector<8x8xf32>
    %123 = arith.subf %119, %122 : vector<8x8xf32>
    %124 = math.exp %123 : vector<8x8xf32>
    %cst_50 = arith.constant dense<0.000000e+00> : vector<8xf32>
    %125 = vector.multi_reduction <add>, %124, %cst_50 [1] : vector<8x8xf32> to vector<8xf32>
    %126 = vector.shape_cast %125 : vector<8xf32> to vector<8x1xf32>
    %127 = tpu.reciprocal %126 {approx = true} : vector<8x1xf32> -> vector<8x1xf32>
    %128 = vector.broadcast %127 : vector<8x1xf32> to vector<8x8xf32>
    %129 = arith.mulf %124, %128 : vector<8x8xf32>
    %cst_51 = arith.constant dense<0.000000e+00> : vector<8x8xf32>
    %130 = tpu.matmul %129, %116, %cst_51 {dimension_numbers = #tpu.dot_dimension_numbers<[1], [0], [0], [1], [0, 0, 1, 1], [], []>} : vector<8x8xf32>, vector<8x8xf32>, vector<8x8xf32> -> vector<8x8xf32>
    %c8_52 = arith.constant 8 : index
    %c8_53 = arith.constant 8 : index
    %131 = vector.load %arg13[%c8_52, %c8_53] : memref<16x32xf32, #tpu.memory_space<vmem>>, vector<8x8xf32>
    tpu.vector_store %arg13[%c8_52, %c8_53], %130 {strides = array<i32>} : memref<16x32xf32, #tpu.memory_space<vmem>>, vector<8x8xf32>,
    %132 = vector.extract_strided_slice %23 {offsets = [8, 16], sizes = [8, 8], strides = [1, 1]} : vector<16x64xf32> to vector<8x8xf32>
    %133 = vector.extract_strided_slice %23 {offsets = [8, 40], sizes = [8, 8], strides = [1, 1]} : vector<16x64xf32> to vector<8x8xf32>
    %134 = vector.extract_strided_slice %23 {offsets = [8, 56], sizes = [8, 8], strides = [1, 1]} : vector<16x64xf32> to vector<8x8xf32>
    %cst_54 = arith.constant dense<0.000000e+00> : vector<8x8xf32>
    %135 = tpu.matmul %132, %133, %cst_54 {dimension_numbers = #tpu.dot_dimension_numbers<[1], [1], [0], [0], [0, 0, 1, 0], [], []>} : vector<8x8xf32>, vector<8x8xf32>, vector<8x8xf32> -> vector<8x8xf32>
    %cst_55 = arith.constant 0.353553385 : f32
    %136 = vector.broadcast %cst_55 : f32 to vector<8x8xf32>
    %137 = arith.mulf %135, %136 : vector<8x8xf32>
    %cst_56 = arith.constant dense<0xFF800000> : vector<8xf32>
    %138 = vector.multi_reduction <maximumf>, %137, %cst_56 [1] : vector<8x8xf32> to vector<8xf32>
    %139 = vector.shape_cast %138 : vector<8xf32> to vector<8x1xf32>
    %140 = vector.broadcast %139 : vector<8x1xf32> to vector<8x8xf32>
    %141 = arith.subf %137, %140 : vector<8x8xf32>
    %142 = math.exp %141 : vector<8x8xf32>
    %cst_57 = arith.constant dense<0.000000e+00> : vector<8xf32>
    %143 = vector.multi_reduction <add>, %142, %cst_57 [1] : vector<8x8xf32> to vector<8xf32>
    %144 = vector.shape_cast %143 : vector<8xf32> to vector<8x1xf32>
    %145 = tpu.reciprocal %144 {approx = true} : vector<8x1xf32> -> vector<8x1xf32>
    %146 = vector.broadcast %145 : vector<8x1xf32> to vector<8x8xf32>
    %147 = arith.mulf %142, %146 : vector<8x8xf32>
    %cst_58 = arith.constant dense<0.000000e+00> : vector<8x8xf32>
    %148 = tpu.matmul %147, %134, %cst_58 {dimension_numbers = #tpu.dot_dimension_numbers<[1], [0], [0], [1], [0, 0, 1, 1], [], []>} : vector<8x8xf32>, vector<8x8xf32>, vector<8x8xf32> -> vector<8x8xf32>
    %c8_59 = arith.constant 8 : index
    %c16_60 = arith.constant 16 : index
    %149 = vector.load %arg13[%c8_59, %c16_60] : memref<16x32xf32, #tpu.memory_space<vmem>>, vector<8x8xf32>
    tpu.vector_store %arg13[%c8_59, %c16_60], %148 {strides = array<i32>} : memref<16x32xf32, #tpu.memory_space<vmem>>, vector<8x8xf32>,
    %150 = vector.extract_strided_slice %23 {offsets = [8, 24], sizes = [8, 8], strides = [1, 1]} : vector<16x64xf32> to vector<8x8xf32>
    %151 = vector.extract_strided_slice %23 {offsets = [8, 40], sizes = [8, 8], strides = [1, 1]} : vector<16x64xf32> to vector<8x8xf32>
    %152 = vector.extract_strided_slice %23 {offsets = [8, 56], sizes = [8, 8], strides = [1, 1]} : vector<16x64xf32> to vector<8x8xf32>
    %cst_61 = arith.constant dense<0.000000e+00> : vector<8x8xf32>
    %153 = tpu.matmul %150, %151, %cst_61 {dimension_numbers = #tpu.dot_dimension_numbers<[1], [1], [0], [0], [0, 0, 1, 0], [], []>} : vector<8x8xf32>, vector<8x8xf32>, vector<8x8xf32> -> vector<8x8xf32>
    %cst_62 = arith.constant 0.353553385 : f32
    %154 = vector.broadcast %cst_62 : f32 to vector<8x8xf32>
    %155 = arith.mulf %153, %154 : vector<8x8xf32>
    %cst_63 = arith.constant dense<0xFF800000> : vector<8xf32>
    %156 = vector.multi_reduction <maximumf>, %155, %cst_63 [1] : vector<8x8xf32> to vector<8xf32>
    %157 = vector.shape_cast %156 : vector<8xf32> to vector<8x1xf32>
    %158 = vector.broadcast %157 : vector<8x1xf32> to vector<8x8xf32>
    %159 = arith.subf %155, %158 : vector<8x8xf32>
    %160 = math.exp %159 : vector<8x8xf32>
    %cst_64 = arith.constant dense<0.000000e+00> : vector<8xf32>
    %161 = vector.multi_reduction <add>, %160, %cst_64 [1] : vector<8x8xf32> to vector<8xf32>
    %162 = vector.shape_cast %161 : vector<8xf32> to vector<8x1xf32>
    %163 = tpu.reciprocal %162 {approx = true} : vector<8x1xf32> -> vector<8x1xf32>
    %164 = vector.broadcast %163 : vector<8x1xf32> to vector<8x8xf32>
    %165 = arith.mulf %160, %164 : vector<8x8xf32>
    %cst_65 = arith.constant dense<0.000000e+00> : vector<8x8xf32>
    %166 = tpu.matmul %165, %152, %cst_65 {dimension_numbers = #tpu.dot_dimension_numbers<[1], [0], [0], [1], [0, 0, 1, 1], [], []>} : vector<8x8xf32>, vector<8x8xf32>, vector<8x8xf32> -> vector<8x8xf32>
    %c8_66 = arith.constant 8 : index
    %c24_67 = arith.constant 24 : index
    %167 = vector.load %arg13[%c8_66, %c24_67] : memref<16x32xf32, #tpu.memory_space<vmem>>, vector<8x8xf32>
    tpu.vector_store %arg13[%c8_66, %c24_67], %166 {strides = array<i32>} : memref<16x32xf32, #tpu.memory_space<vmem>>, vector<8x8xf32>,
    %c0_68 = arith.constant 0 : index
    %c0_69 = arith.constant 0 : index
    %168 = vector.load %arg13[%c0_68, %c0_69] : memref<16x32xf32, #tpu.memory_space<vmem>>, vector<16x32xf32>
    %c0_70 = arith.constant 0 : index
    %c0_71 = arith.constant 0 : index
    %169 = vector.load %arg7[%c0_70, %c0_71] : memref<32x32xf32, #tpu.memory_space<vmem>>, vector<32x32xf32>
    %cst_72 = arith.constant dense<0.000000e+00> : vector<16x32xf32>
    %170 = tpu.matmul %168, %169, %cst_72 {dimension_numbers = #tpu.dot_dimension_numbers<[1], [1], [0], [0], [0, 0, 1, 0], [], []>} : vector<16x32xf32>, vector<32x32xf32>, vector<16x32xf32> -> vector<16x32xf32>
    %171 = arith.addf %0, %170 : vector<16x32xf32>
    %172 = arith.mulf %171, %171 : vector<16x32xf32>
    %cst_73 = arith.constant dense<0.000000e+00> : vector<16xf32>
    %173 = vector.multi_reduction <add>, %172, %cst_73 [1] : vector<16x32xf32> to vector<16xf32>
    %174 = vector.shape_cast %173 : vector<16xf32> to vector<16x1xf32>
    %cst_74 = arith.constant 3.200000e+01 : f32
    %175 = vector.broadcast %cst_74 : f32 to vector<16x1xf32>
    %176 = arith.divf %174, %175 : vector<16x1xf32>
    %177 = math.sqrt %176 : vector<16x1xf32>
    %cst_75 = arith.constant 9.99999997E-7 : f32
    %178 = vector.broadcast %cst_75 : f32 to vector<16x1xf32>
    %179 = arith.addf %177, %178 : vector<16x1xf32>
    %180 = tpu.reciprocal %179 {approx = true} : vector<16x1xf32> -> vector<16x1xf32>
    %181 = vector.broadcast %180 : vector<16x1xf32> to vector<16x32xf32>
    %182 = arith.mulf %171, %181 : vector<16x32xf32>
    %c0_76 = arith.constant 0 : index
    %c0_77 = arith.constant 0 : index
    %183 = vector.load %arg8[%c0_76, %c0_77] : memref<1x32xf32, #tpu.memory_space<vmem>>, vector<1x32xf32>
    %184 = vector.broadcast %183 : vector<1x32xf32> to vector<16x32xf32>
    %185 = arith.mulf %182, %184 : vector<16x32xf32>
    %c0_78 = arith.constant 0 : index
    %c0_79 = arith.constant 0 : index
    %186 = vector.load %arg9[%c0_78, %c0_79] : memref<96x32xf32, #tpu.memory_space<vmem>>, vector<96x32xf32>
    %cst_80 = arith.constant dense<0.000000e+00> : vector<16x96xf32>
    %187 = tpu.matmul %185, %186, %cst_80 {dimension_numbers = #tpu.dot_dimension_numbers<[1], [1], [0], [0], [0, 0, 1, 0], [], []>} : vector<16x32xf32>, vector<96x32xf32>, vector<16x96xf32> -> vector<16x96xf32>
    %c0_81 = arith.constant 0 : index
    %c0_82 = arith.constant 0 : index
    %188 = vector.load %arg10[%c0_81, %c0_82] : memref<96x32xf32, #tpu.memory_space<vmem>>, vector<96x32xf32>
    %cst_83 = arith.constant dense<0.000000e+00> : vector<16x96xf32>
    %189 = tpu.matmul %185, %188, %cst_83 {dimension_numbers = #tpu.dot_dimension_numbers<[1], [1], [0], [0], [0, 0, 1, 0], [], []>} : vector<16x32xf32>, vector<96x32xf32>, vector<16x96xf32> -> vector<16x96xf32>
    %190 = arith.negf %187 : vector<16x96xf32>
    %191 = math.exp %190 : vector<16x96xf32>
    %cst_84 = arith.constant 1.000000e+00 : f32
    %192 = vector.broadcast %cst_84 : f32 to vector<16x96xf32>
    %193 = arith.addf %192, %191 : vector<16x96xf32>
    %194 = arith.divf %192, %193 : vector<16x96xf32>
    %195 = arith.mulf %187, %194 : vector<16x96xf32>
    %196 = arith.mulf %195, %189 : vector<16x96xf32>
    %c0_85 = arith.constant 0 : index
    %c0_86 = arith.constant 0 : index
    %197 = vector.load %arg11[%c0_85, %c0_86] : memref<32x96xf32, #tpu.memory_space<vmem>>, vector<32x96xf32>
    %cst_87 = arith.constant dense<0.000000e+00> : vector<16x32xf32>
    %198 = tpu.matmul %196, %197, %cst_87 {dimension_numbers = #tpu.dot_dimension_numbers<[1], [1], [0], [0], [0, 0, 1, 0], [], []>} : vector<16x96xf32>, vector<32x96xf32>, vector<16x32xf32> -> vector<16x32xf32>
    %199 = arith.addf %171, %198 : vector<16x32xf32>
    %c0_88 = arith.constant 0 : index
    %c0_89 = arith.constant 0 : index
    %200 = vector.load %arg12[%c0_88, %c0_89] : memref<16x32xf32, #tpu.memory_space<vmem>>, vector<16x32xf32>
    tpu.vector_store %arg12[%c0_88, %c0_89], %199 {strides = array<i32>} : memref<16x32xf32, #tpu.memory_space<vmem>>, vector<16x32xf32>,
    return
  }
  func.func @transform_0(%arg0: i32) -> (i32, i32) {
    %c0_i32 = arith.constant 0 : i32
    %c0_i32_0 = arith.constant 0 : i32
    %c0_i32_1 = arith.constant 0 : i32
    return %c0_i32, %c0_i32_0 : i32, i32
  }
  func.func @transform_1(%arg0: i32) -> (i32, i32) {
    %c0_i32 = arith.constant 0 : i32
    %c0_i32_0 = arith.constant 0 : i32
    %c0_i32_1 = arith.constant 0 : i32
    return %c0_i32, %c0_i32_0 : i32, i32
  }
  func.func @transform_2(%arg0: i32) -> (i32, i32) {
    %c0_i32 = arith.constant 0 : i32
    %c0_i32_0 = arith.constant 0 : i32
    %c0_i32_1 = arith.constant 0 : i32
    return %c0_i32, %c0_i32_0 : i32, i32
  }
  func.func @transform_3(%arg0: i32) -> (i32, i32) {
    %c0_i32 = arith.constant 0 : i32
    %c0_i32_0 = arith.constant 0 : i32
    %c0_i32_1 = arith.constant 0 : i32
    return %c0_i32, %c0_i32_0 : i32, i32
  }
  func.func @transform_4(%arg0: i32) -> (i32, i32) {
    %c0_i32 = arith.constant 0 : i32
    %c0_i32_0 = arith.constant 0 : i32
    %c0_i32_1 = arith.constant 0 : i32
    return %c0_i32, %c0_i32_0 : i32, i32
  }
  func.func @transform_5(%arg0: i32) -> (i32, i32) {
    %c0_i32 = arith.constant 0 : i32
    %c0_i32_0 = arith.constant 0 : i32
    %c0_i32_1 = arith.constant 0 : i32
    return %c0_i32, %c0_i32_0 : i32, i32
  }
  func.func @transform_6(%arg0: i32) -> (i32, i32) {
    %c0_i32 = arith.constant 0 : i32
    %c0_i32_0 = arith.constant 0 : i32
    %c0_i32_1 = arith.constant 0 : i32
    return %c0_i32, %c0_i32_0 : i32, i32
  }
  func.func @transform_7(%arg0: i32) -> (i32, i32) {
    %c0_i32 = arith.constant 0 : i32
    %c0_i32_0 = arith.constant 0 : i32
    %c0_i32_1 = arith.constant 0 : i32
    return %c0_i32, %c0_i32_0 : i32, i32
  }
  func.func @transform_8(%arg0: i32) -> (i32, i32) {
    %c0_i32 = arith.constant 0 : i32
    %c0_i32_0 = arith.constant 0 : i32
    %c0_i32_1 = arith.constant 0 : i32
    return %c0_i32, %c0_i32_0 : i32, i32
  }
  func.func @transform_9(%arg0: i32) -> (i32, i32) {
    %c0_i32 = arith.constant 0 : i32
    %c0_i32_0 = arith.constant 0 : i32
    %c0_i32_1 = arith.constant 0 : i32
    return %c0_i32, %c0_i32_0 : i32, i32
  }
  func.func @transform_10(%arg0: i32) -> (i32, i32) {
    %c0_i32 = arith.constant 0 : i32
    %c0_i32_0 = arith.constant 0 : i32
    %c0_i32_1 = arith.constant 0 : i32
    return %c0_i32, %c0_i32_0 : i32, i32
  }
  func.func @transform_11(%arg0: i32) -> (i32, i32) {
    %c0_i32 = arith.constant 0 : i32
    %c0_i32_0 = arith.constant 0 : i32
    %c0_i32_1 = arith.constant 0 : i32
    return %c0_i32, %c0_i32_0 : i32, i32
  }
}

</mosaic_0001>

<bundles_post_ra>
// kernel: tile.41
= control target key start
LH: loop header
LB: loop body
LE: loop exit
PB: predicated region body
PF: predicated region fallthrough
CT: control target
= control target key end

     0   :  { %vm36_vm0 = vcmask 1047556   ;;  %vm38_vm1 = vcmask 64512   ;;  %vm48_vm2 = vcmask 130112   ;;  %s99_s0 = inlined_call_operand.vmem [shape: f32[8,2,8], index: 0, kind: input, shape index: {}]   ;;  %s100_s1 = inlined_call_operand.vmem [shape: f32[8,16], index: 1, kind: output, shape index: {}]  }
   0x1   :  { %v50_v0 = vld [vmem:[%s99_s0 + $0xe] sm:$0x3]  ;;  %v51_v1 = vld [vmem:[%s99_s0 + $0xc] sm:$0x3]  ;;  %v52_v2 = vld [vmem:[%s99_s0 + $0xa] sm:$0x3] }
   0x2   :  { %7 = vst [vmem:[#allocation0 + $0x38] sm:$0x3] %v50_v0  ;;  %v53_v3 = vld [vmem:[%s99_s0 + $0x8] sm:$0x3]  ;;  %v54_v4 = vld [vmem:[%s99_s0 + $0x6] sm:$0x3] }
   0x3   :  { %11 = vst [vmem:[#allocation0 + $0x30] sm:$0x3] %v51_v1  ;;  %v55_v5 = vld [vmem:[%s99_s0 + $0x4] sm:$0x3]  ;;  %v56_v6 = vld [vmem:[%s99_s0 + $0x2] sm:$0x3] }
   0x4   :  { %15 = vst [vmem:[#allocation0 + $0x28] sm:$0x3] %v52_v2  ;;  %v32_v7 = vld [vmem:[%s99_s0] sm:$0x3]  ;;  %s58_s0 = smov 8  }
   0x5   :  { %19 = vst [vmem:[#allocation0 + $0x20] sm:$0x3] %v53_v3 }
   0x6   :  { %23 = vst [vmem:[#allocation0 + $0x18] sm:$0x3] %v54_v4 }
   0x7   :  { %27 = vst [vmem:[#allocation0 + $0x10] sm:$0x3] %v55_v5 }
   0x8   :  { %31 = vst [vmem:[#allocation0 + $0x8] sm:$0x3] %v56_v6 }
   0x9   :  { %33 = vst [vmem:[#allocation0] sm:$0x3] %v32_v7 }
   0xc   :  { %v35_v8 = vld [vmem:[#allocation0] ss:$8 sm:$0xf0]   ;;  %v43_v9 = vld [vmem:[#allocation0 + $0x1] ss:$8 sm:$0xf0]  }
  0x10   :  { %v34_v10 = vld [vmem:[#allocation0] ss:$8 sm:$0xf]   ;;  %v41_v11 = vld [vmem:[#allocation0 + $0x1] ss:$8 sm:$0xf]  }
  0x11   :  { %v37_v12 = vsel %vm36_vm0, %v35_v8, %v34_v10  ;;  %v45_v13 = vsel %vm36_vm0, %v43_v9, %v41_v11 }
  0x12   :  { %46 = vrot.lane.b32.xlu0 %v45_v13, %s58_s0  ;;  %39 = vst.msk [vmem:[%s100_s1] sm:$0xff] %vm38_vm1, %v37_v12  }
  0x84   :  { %v47_v14 = vpop.permute.xlu0 %46  }
  0x85   :  { %49 = vst.msk [vmem:[%s100_s1] sm:$0xff] %vm48_vm2, %v47_v14  }

// kernel: tile.29
= control target key start
LH: loop header
LB: loop body
LE: loop exit
PB: predicated region body
PF: predicated region fallthrough
CT: control target
= control target key end

     0   :  { %vm36_vm0 = vcmask 1047556   ;;  %s81_s22 = smov 8   ;;  %s82_s23 = smov 16   ;;  %vm38_vm1 = vcmask 64512   ;;  %vm48_vm2 = vcmask 261312   ;;  %vm58_vm3 = vcmask 195712   ;;  %s133_s0 = inlined_call_operand.vmem [shape: f32[8,4,8], index: 0, kind: input, shape index: {}]   ;;  %s134_s1 = inlined_call_operand.vmem [shape: f32[8,32], index: 1, kind: output, shape index: {}]  }
   0x1   :  { %v70_v0 = vld [vmem:[%s133_s0 + $0x1c] sm:$0xf]  ;;  %v71_v1 = vld [vmem:[%s133_s0 + $0x18] sm:$0xf]  ;;  %v72_v2 = vld [vmem:[%s133_s0 + $0x14] sm:$0xf] }
   0x2   :  { %7 = vst [vmem:[#allocation0 + $0x38] sm:$0xf] %v70_v0  ;;  %v73_v3 = vld [vmem:[%s133_s0 + $0x10] sm:$0xf]  ;;  %v74_v4 = vld [vmem:[%s133_s0 + $0xc] sm:$0xf] }
   0x3   :  { %11 = vst [vmem:[#allocation0 + $0x30] sm:$0xf] %v71_v1  ;;  %v75_v5 = vld [vmem:[%s133_s0 + $0x8] sm:$0xf]  ;;  %v76_v6 = vld [vmem:[%s133_s0 + $0x4] sm:$0xf] }
   0x4   :  { %15 = vst [vmem:[#allocation0 + $0x28] sm:$0xf] %v72_v2  ;;  %v32_v7 = vld [vmem:[%s133_s0] sm:$0xf]  ;;  %s80_s0 = smov 24   ;;  %vm68_vm4 = vcmask 130112  }
   0x5   :  { %19 = vst [vmem:[#allocation0 + $0x20] sm:$0xf] %v73_v3 }
   0x6   :  { %23 = vst [vmem:[#allocation0 + $0x18] sm:$0xf] %v74_v4 }
   0x7   :  { %27 = vst [vmem:[#allocation0 + $0x10] sm:$0xf] %v75_v5 }
   0x8   :  { %31 = vst [vmem:[#allocation0 + $0x8] sm:$0xf] %v76_v6 }
   0x9   :  { %33 = vst [vmem:[#allocation0] sm:$0xf] %v32_v7 }
   0xc   :  { %v43_v8 = vld [vmem:[#allocation0 + $0x3] ss:$8 sm:$0xf0]   ;;  %v63_v9 = vld [vmem:[#allocation0 + $0x1] ss:$8 sm:$0xf0]  }
   0xd   :  { %v53_v15 = vld [vmem:[#allocation0 + $0x2] ss:$8 sm:$0xf0]   ;;  %v35_v18 = vld [vmem:[#allocation0] ss:$8 sm:$0xf0]  }
  0x10   :  { %v41_v10 = vld [vmem:[#allocation0 + $0x3] ss:$8 sm:$0xf]   ;;  %v61_v12 = vld [vmem:[#allocation0 + $0x1] ss:$8 sm:$0xf]  }
  0x11   :  { %v45_v11 = vsel %vm36_vm0, %v43_v8, %v41_v10  ;;  %v65_v13 = vsel %vm36_vm0, %v63_v9, %v61_v12  ;;  %v51_v14 = vld [vmem:[#allocation0 + $0x2] ss:$8 sm:$0xf]   ;;  %v34_v17 = vld [vmem:[#allocation0] ss:$8 sm:$0xf]  }
  0x12   :  { %46 = vrot.lane.b32.xlu0 %v45_v11, %s80_s0  ;;  %66 = vrot.lane.b32.xlu1 %v65_v13, %s81_s22  ;;  %v55_v16 = vsel %vm36_vm0, %v53_v15, %v51_v14  ;;  %v37_v19 = vsel %vm36_vm0, %v35_v18, %v34_v17 }
  0x13   :  { %39 = vst.msk [vmem:[%s134_s1] sm:$0xff] %vm38_vm1, %v37_v19  }
  0x1a   :  { %56 = vrot.lane.b32.xlu0 %v55_v16, %s82_s23 }
  0x84   :  { %v47_v20 = vpop.permute.xlu0 %46   ;;  %v67_v21 = vpop.permute.xlu1 %66  }
  0x85   :  { %49 = vst.msk [vmem:[%s134_s1] sm:$0xff] %vm48_vm2, %v47_v20  }
  0x8c   :  { %v57_v22 = vpop.permute.xlu0 %56  }
  0x8d   :  { %59 = vst.msk [vmem:[%s134_s1] sm:$0xff] %vm58_vm3, %v57_v22  }
  0x8e   :  { %69 = vst.msk [vmem:[%s134_s1] sm:$0xff] %vm68_vm4, %v67_v21  }

// kernel: llama_layer.1
= control target key start
LH: loop header
LB: loop body
LE: loop exit
PB: predicated region body
PF: predicated region fallthrough
CT: control target
= control target key end

     0   :  { %vm43_vm0 = vcmask 261120   ;;  %s1716_s0 = inlined_call_operand.vmem [shape: f32[16,32], index: 0, kind: input, shape index: {}]   ;;  %s1717_s1 = inlined_call_operand.vmem [shape: f32[1,32], index: 1, kind: input, shape index: {}]   ;;  %s1718_s2 = inlined_call_operand.vmem [shape: f32[64,32], index: 2, kind: input, shape index: {}]   ;;  %s1719_s3 = inlined_call_operand.vmem [shape: f32[64,32], index: 3, kind: input, shape index: {}]   ;;  %s1720_s4 = inlined_call_operand.vmem [shape: f32[16,64], index: 4, kind: input, shape index: {}]   ;;  %s1721_s5 = inlined_call_operand.vmem [shape: f32[16,64], index: 5, kind: input, shape index: {}]   ;;  %s1722_s6 = inlined_call_operand.vmem [shape: f32[32,32], index: 6, kind: input, shape index: {}]   ;;  %s1723_s7 = inlined_call_operand.vmem [shape: f32[1,32], index: 7, kind: input, shape index: {}]   ;;  %s1724_s8 = inlined_call_operand.vmem [shape: f32[96,32], index: 8, kind: input, shape index: {}]   ;;  %s1725_s9 = inlined_call_operand.vmem [shape: f32[96,32], index: 9, kind: input, shape index: {}]   ;;  %s1726_s10 = inlined_call_operand.vmem [shape: f32[32,96], index: 10, kind: input, shape index: {}]   ;;  %s1727_s11 = inlined_call_operand.hbm [shape: f32[16,32], index: 11, kind: output, shape index: {}]  }
   0x1   :  { %v1369_v0 = vld [vmem:[%s1716_s0] sm:$0xff] }
   0x2   :  { %v41_v1 = vmul.f32 %v1369_v0, %v1369_v0 }
   0x3   :  { %16 = vsyncpa [#allocation4], 0  ;;  %v1293_v3 = vmov 32.0   ;;  %v102_v4 = vld [vmem:[%s1718_s2 + $0x38] sm:$0xff]  ;;  %v101_v6 = vld [vmem:[%s1718_s2 + $0x30] sm:$0xff]  ;;  %s1295_s18 = smov 96  }
   0x4   :  { %v44_v2 = vsel %vm43_vm0, %v41_v1, 0.0  ;;  %1209 = vrcp.f32 %v1293_v3  ;;  %v163_v5 = vld [vmem:[%s1719_s3 + $0x38] sm:$0xff]  ;;  %1108 = vmatpush.xpose.msk.msra.mxu0 %vm43_vm0, %v102_v4  ;;  %v162_v7 = vld [vmem:[%s1719_s3 + $0x30] sm:$0xff]  ;;  %v100_v9 = vld [vmem:[%s1718_s2 + $0x28] sm:$0xff]  ;;  %s1296_s19 = smov 112   ;;  %s1297_s20 = smov 88  }
   0x5   :  { %45 = vadd.xlane.f32.xlu0 %v44_v2  ;;  %1118 = vmatpush.xpose.msk.msra.mxu1 %vm43_vm0, %v163_v5  ;;  %v161_v10 = vld [vmem:[%s1719_s3 + $0x28] sm:$0xff]  ;;  %v99_v12 = vld [vmem:[%s1718_s2 + $0x20] sm:$0xff]  ;;  %v98_v15 = vld [vmem:[%s1718_s2 + $0x18] sm:$0xff]  ;;  %s1298_s21 = smov 104   ;;  %vm224_vm6 = vcmask 64512   ;;  %s1301_s26 = smov 8  }
   0x6   :  { %v160_v13 = vld [vmem:[%s1719_s3 + $0x20] sm:$0xff]  ;;  %v159_v16 = vld [vmem:[%s1719_s3 + $0x18] sm:$0xff]  ;;  %v97_v18 = vld [vmem:[%s1718_s2 + $0x10] sm:$0xff]  ;;  %s1302_s27 = smov 16   ;;  %s1303_s28 = smov 24   ;;  %vm351_vm7 = vcmask 130112  }
   0x7   :  { %v158_v19 = vld [vmem:[%s1719_s3 + $0x10] sm:$0xff]  ;;  %v96_v21 = vld [vmem:[%s1718_s2 + $0x8] sm:$0xff]  ;;  %v95_v24 = vld [vmem:[%s1718_s2] sm:$0xff]  ;;  %vm423_vm8 = vcmask 195712   ;;  %vm488_vm9 = vcmask 261312   ;;  %vm1044_vm14 = vcmask 785408  }
   0x8   :  { %1109 = vmatpush.xpose.msk.msra.mxu0 %vm43_vm0, %v101_v6  ;;  %v157_v22 = vld [vmem:[%s1719_s3 + $0x8] sm:$0xff]  ;;  %v156_v25 = vld [vmem:[%s1719_s3] sm:$0xff]  ;;  %s1305_s22 = smov 128  }
   0x9   :  { %1119 = vmatpush.xpose.msk.msra.mxu1 %vm43_vm0, %v162_v7  ;;  %v1444_v28 = vld [vmem:[%s1716_s0 + $0x8] sm:$0xff]  ;;  %v1207_v42 = vld [vmem:[%s1717_s1] ss:$0 sm:$0xff]  ;;  %s1294_s1 = smov 120  }
   0xa   :  { %v1210_v8 = vpop.eup %1209  ;;  %v42_v29 = vmul.f32 %v1444_v28, %v1444_v28  ;;  %v211_v49 = vld [vmem:[%s1720_s4] sm:$0xff] }
   0xb   :  { %v51_v11 = vmul.f32 32.0, %v1210_v8  ;;  %vm55_vm1 = vweird.f32 %v1210_v8  ;;  %v215_v50 = vld [vmem:[%s1721_s5] sm:$0xff] }
   0xc   :  { %1110 = vmatpush.xpose.msk.msra.mxu0 %vm43_vm0, %v100_v9  ;;  %v47_v30 = vsel %vm43_vm0, %v42_v29, 0.0 }
   0xd   :  { %1120 = vmatpush.xpose.msk.msra.mxu1 %vm43_vm0, %v161_v10  ;;  %v52_v14 = vsub.f32 1.0, %v51_v11  ;;  %48 = vadd.xlane.f32.xlu1 %v47_v30  ;;  %v212_v10 = vld [vmem:[%s1720_s4 + $0x8] sm:$0xff]  ;;  %s1299_s4 = smov 80  }
   0xe   :  { %v216_v11 = vld [vmem:[%s1721_s5 + $0x8] sm:$0xff]  ;;  %s1300_s5 = smov 72  }
   0xf   :  { %v53_v17 = vmul.f32 %v1210_v8, %v52_v14 }
  0x10   :  { %1111 = vmatpush.xpose.msk.msra.mxu0 %vm43_vm0, %v99_v12 }
  0x11   :  { %1121 = vmatpush.xpose.msk.msra.mxu1 %vm43_vm0, %v160_v13  ;;  %v54_v20 = vadd.f32 %v1210_v8, %v53_v17 }
  0x13   :  { %v1428_v23 = vsel %vm55_vm1, %v1210_v8, %v54_v20 }
  0x14   :  { %1112 = vmatpush.xpose.msk.msra.mxu0 %vm43_vm0, %v98_v15 }
  0x15   :  { %1122 = vmatpush.xpose.msk.msra.mxu1 %vm43_vm0, %v159_v16 }
  0x18   :  { %1113 = vmatpush.xpose.msk.msra.mxu0 %vm43_vm0, %v97_v18 }
  0x19   :  { %1123 = vmatpush.xpose.msk.msra.mxu1 %vm43_vm0, %v158_v19 }
  0x1c   :  { %1114 = vmatpush.xpose.msk.msra.mxu0 %vm43_vm0, %v96_v21 }
  0x1d   :  { %1124 = vmatpush.xpose.msk.msra.mxu1 %vm43_vm0, %v157_v22 }
  0x20   :  { %1115 = vmatpush.xpose.msk.msra.mxu0 %vm43_vm0, %v95_v24 }
  0x21   :  { %1125 = vmatpush.xpose.msk.msra.mxu1 %vm43_vm0, %v156_v25 }
  0x78   :  { %v46_v26 = vpop.xlane.xlu0 %45 }
  0x79   :  { %v57_v27 = vmul.f32 %v1428_v23, %v46_v26 }
  0x7b   :  { %1211 = vrsqrt.f32 %v57_v27  ;;  %vm66_vm2 = vcmp.eq.f32.partialorder %v57_v27, inf  ;;  %v69_v38 = vand.u32 2147483648, %v57_v27  ;;  %vm68_vm3 = vcmp.eq.f32.partialorder %v57_v27, 0.0 }
  0x80   :  { %v49_v46 = vpop.xlane.xlu1 %48 }
  0x81   :  { %v1212_v31 = vpop.eup %1211  ;;  %v58_v47 = vmul.f32 %v1428_v23, %v49_v46 }
  0x82   :  { %v60_v32 = vmul.f32 %v1212_v31, %v57_v27 }
  0x83   :  { %vm78_vm4 = vcmp.eq.f32.partialorder %v58_v47, inf  ;;  %v81_v61 = vand.u32 2147483648, %v58_v47  ;;  %vm80_vm5 = vcmp.eq.f32.partialorder %v58_v47, 0.0 }
  0x84   :  { %v61_v33 = vmul.f32 %v1212_v31, %v60_v32 }
  0x86   :  { %v62_v34 = vmul.f32 0.5, %v61_v33 }
  0x88   :  { %v63_v35 = vsub.f32 1.5, %v62_v34 }
  0x8a   :  { %v64_v36 = vmul.f32 %v1212_v31, %v63_v35 }
  0x8c   :  { %v65_v37 = vmul.f32 %v64_v36, %v57_v27 }
  0x8e   :  { %v67_v39 = vsel %vm66_vm2, %v57_v27, %v65_v37 }
  0x8f   :  { %v70_v40 = vsel %vm68_vm3, %v69_v38, %v67_v39 }
  0x90   :  { %v83_v41 = vadd.f32 1e-06, %v70_v40 }
  0x92   :  { %1213 = vrcp.f32 %v83_v41 }
  0x93   :  { %1215 = vrsqrt.f32 %v58_v47 }
  0x98   :  { %v1214_v43 = vpop.eup %1213 }
  0x99   :  { %v87_v44 = vmul.f32 %v1214_v43, %v1369_v0  ;;  %v1216_v48 = vpop.eup %1215 }
  0x9a   :  { %v72_v51 = vmul.f32 %v1216_v48, %v58_v47 }
  0x9b   :  { %v93_v45 = vmul.f32 %v1207_v42, %v87_v44 }
  0x9c   :  { %v73_v56 = vmul.f32 %v1216_v48, %v72_v51 }
  0x9d   :  { %1116 = vmatmul.msk.f32.vlgmr.msra.gmra.mxu0 %vm43_vm0, %v93_v45  ;;  %1126 = vmatmul.msk.f32.vlgmr.msra.gmra.mxu1 %vm43_vm0, %v93_v45 }
  0x9e   :  { %v74_v58 = vmul.f32 0.5, %v73_v56 }
  0xa0   :  { %v75_v59 = vsub.f32 1.5, %v74_v58 }
  0xa2   :  { %v76_v60 = vmul.f32 %v1216_v48, %v75_v59 }
  0xa4   :  { %v77_v62 = vmul.f32 %v76_v60, %v58_v47 }
  0xa6   :  { %v79_v63 = vsel %vm78_vm4, %v58_v47, %v77_v62 }
  0xa7   :  { %v82_v1 = vsel %vm80_vm5, %v81_v61, %v79_v63 }
  0xa8   :  { %v84_v2 = vadd.f32 1e-06, %v82_v1 }
  0xaa   :  { %1217 = vrcp.f32 %v84_v2 }
  0xb0   :  { %v1218_v3 = vpop.eup %1217 }
  0xb1   :  { %v88_v4 = vmul.f32 %v1218_v3, %v1444_v28 }
  0xb3   :  { %v94_v5 = vmul.f32 %v1207_v42, %v88_v4 }
  0xb5   :  { %1117 = vmatmul.msk.f32.gmra.mxu0 %vm43_vm0, %v94_v5  ;;  %1127 = vmatmul.msk.f32.gmra.mxu1 %vm43_vm0, %v94_v5 }
 0x11a   :  { %v150_v52 = vpop.f32.mrf.mxu0  ;;  %v205_v53 = vpop.f32.mrf.mxu1 }
 0x11b   :  { %v213_v54 = vmul.f32 %v211_v49, %v150_v52  ;;  %v217_v55 = vmul.f32 %v215_v50, %v205_v53 }
 0x11d   :  { %v1462_v57 = vadd.f32 %v217_v55, %v213_v54 }
 0x11f   :  { %288 = vrot.lane.b32.xlu2 %v1462_v57, %s1294_s1  ;;  %222 = vrot.lane.b32.xlu0 %v1462_v57, %s1295_s18 }
 0x127   :  { %353 = vrot.lane.b32.xlu2 %v1462_v57, %s1296_s19  ;;  %355 = vrot.lane.b32.xlu0 %v1462_v57, %s1297_s20 }
 0x12f   :  { %425 = vrot.lane.b32.xlu0 %v1462_v57, %s1298_s21 }
 0x132   :  { %v153_v12 = vpop.f32.mrf.mxu0  ;;  %v208_v13 = vpop.f32.mrf.mxu1 }
 0x133   :  { %v214_v14 = vmul.f32 %v212_v10, %v153_v12  ;;  %v218_v15 = vmul.f32 %v216_v11, %v208_v13 }
 0x135   :  { %v1489_v16 = vadd.f32 %v218_v15, %v214_v14 }
 0x137   :  { %622 = vrot.lane.b32.xlu0 %v1489_v16, %s1297_s20 }
 0x179   :  { %v289_v7 = vpop.permute.xlu2 %288 }
 0x181   :  { %v354_v9 = vpop.permute.xlu2 %353 }
 0x191   :  { %v223_v6 = vpop.permute.xlu0 %222 }
 0x192   :  { %1128 = vmatpush.xpose.msk.msra.mxu2 %vm224_vm6, %v223_v6  ;;  %1131 = vmatpush.xpose.msk.msrb.mxu0 %vm224_vm6, %v223_v6 }
 0x195   :  { %1129 = vmatmul.msk.f32.vlgmr.msra.gmra.mxu2 %vm224_vm6, %v1462_v57  ;;  %1132 = vmatmul.msk.f32.vlgmr.msrb.gmra.mxu0 %vm224_vm6, %v289_v7 }
 0x199   :  { %v356_v8 = vpop.permute.xlu0 %355 }
 0x19a   :  { %1134 = vmatpush.xpose.msk.msra.mxu0 %vm224_vm6, %v356_v8 }
 0x19d   :  { %1135 = vmatmul.msk.f32.vlgmr.msra.gmra.mxu0 %vm224_vm6, %v354_v9 }
 0x1a1   :  { %v426_v24 = vpop.permute.xlu0 %425 }
 0x1a9   :  { %v623_v25 = vpop.permute.xlu0 %622 }
 0x1aa   :  { %1146 = vmatpush.xpose.msk.msrb.mxu0 %vm224_vm6, %v623_v25 }
 0x212   :  { %v309_v17 = vpop.f32.mrf.mxu0 }
 0x213   :  { %v1492_v18 = vmul.f32 0.35355338, %v309_v17 }
 0x215   :  { %v313_v19 = vsel %vm224_vm6, %v1492_v18, -inf }
 0x216   :  { %314 = vmax.xlane.f32.xlu0 %v313_v19 }
 0x218   :  { %v246_v20 = vpop.f32.mrf.mxu2 }
 0x219   :  { %v249_v21 = vmul.f32 0.35355338, %v246_v20 }
 0x21a   :  { %v378_v33 = vpop.f32.mrf.mxu0 }
 0x21b   :  { %v250_v22 = vsel %vm224_vm6, %v249_v21, -inf  ;;  %v381_v34 = vmul.f32 0.35355338, %v378_v33 }
 0x21c   :  { %251 = vmax.xlane.f32.xlu1 %v250_v22 }
 0x21d   :  { %v382_v35 = vsel %vm224_vm6, %v381_v34, -inf }
 0x235   :  { %261 = vrot.lane.b32.xlu1 %v1462_v57, %s1299_s4 }
 0x23d   :  { %556 = vrot.lane.b32.xlu1 %v1489_v16, %s1294_s1 }
 0x245   :  { %691 = vrot.lane.b32.xlu1 %v1489_v16, %s1298_s21  ;;  %s1096_s21 = sshll.u32 %s1727_s11, 4  ;;  %s1097_s21 = int_to_ptr.hbm [resolvable:$true] %s1096_s21 }
 0x289   :  { %v315_v51 = vpop.xlane.xlu0 %314 }
 0x28a   :  { %v316_v55 = vsub.f32 %v1492_v18, %v315_v51 }
 0x28c   :  { %v317_v59 = vmul.f32 1.442695, %v316_v55 }
 0x28f   :  { %v252_v26 = vpop.xlane.xlu1 %251 }
 0x290   :  { %v253_v27 = vsub.f32 %v249_v21, %v252_v26 }
 0x292   :  { %v254_v29 = vmul.f32 1.442695, %v253_v27 }
 0x294   :  { %1219 = vpow2.f32 %v254_v29 }
 0x29a   :  { %v1220_v30 = vpop.eup %1219 }
 0x29b   :  { %v256_v31 = vsel %vm224_vm6, %v1220_v30, 0.0 }
 0x29c   :  { %257 = vadd.xlane.f32.xlu2 %v256_v31 }
 0x2a7   :  { %v262_v32 = vpop.permute.xlu1 %261 }
 0x2a8   :  { %282 = vmatpush.msra.mxu3 %v262_v32  ;;  %342 = vmatpush.msrb.mxu2 %v262_v32 }
 0x2aa   :  { %1137 = vmatpush.xpose.msk.msrb.mxu3 %vm224_vm6, %v356_v8 }
 0x2af   :  { %v557_v41 = vpop.permute.xlu1 %556 }
 0x2b4   :  { %491 = vrot.lane.b32.xlu2 %v1489_v16, %s1295_s18 }
 0x2b7   :  { %v692_v42 = vpop.permute.xlu1 %691 }
 0x2bc   :  { %620 = vrot.lane.b32.xlu2 %v1489_v16, %s1296_s19 }
 0x2e5   :  { %383 = vmax.xlane.f32.xlu2 %v382_v35 }
 0x30f   :  { %v258_v36 = vpop.xlane.xlu2 %257 }
 0x310   :  { %1221 = vrcp.f32 %v258_v36 }
 0x316   :  { %v1222_v37 = vpop.eup %1221 }
 0x317   :  { %v492_v38 = vpop.permute.xlu2 %491  ;;  %v260_v39 = vmul.f32 %v1222_v37, %v1220_v30 }
 0x319   :  { %1130 = vmatmul.msk.f32.vlgmr.msra.gmra.mxu3 %vm224_vm6, %v260_v39 }
 0x31a   :  { %1140 = vmatpush.xpose.msk.msra.mxu3 %vm224_vm6, %v492_v38 }
 0x31f   :  { %v621_v40 = vpop.permute.xlu2 %620 }
 0x320   :  { %1147 = vmatmul.msk.f32.vlgmr.msrb.gmra.mxu0 %vm224_vm6, %v621_v40 }
 0x321   :  { %1138 = vmatmul.msk.f32.vlgmr.msrb.gmra.mxu3 %vm224_vm6, %v426_v24 }
 0x322   :  { %1143 = vmatpush.xpose.msk.msrb.mxu3 %vm224_vm6, %v492_v38 }
 0x329   :  { %1141 = vmatmul.msk.f32.vlgmr.msra.gmra.mxu3 %vm224_vm6, %v1489_v16 }
 0x32a   :  { %1149 = vmatpush.xpose.msk.msra.mxu3 %vm224_vm6, %v623_v25 }
 0x331   :  { %1144 = vmatmul.msk.f32.vlgmr.msrb.gmra.mxu3 %vm224_vm6, %v557_v41 }
 0x339   :  { %1150 = vmatmul.msk.f32.vlgmr.msra.gmra.mxu3 %vm224_vm6, %v692_v42 }
 0x358   :  { %v384_v44 = vpop.xlane.xlu2 %383 }
 0x359   :  { %v385_v47 = vsub.f32 %v381_v34, %v384_v44 }
 0x35b   :  { %v386_v50 = vmul.f32 1.442695, %v385_v47 }
 0x35d   :  { %1223 = vpow2.f32 %v386_v50 }
 0x35e   :  { %1225 = vpow2.f32 %v317_v59 }
 0x363   :  { %v1224_v60 = vpop.eup %1223 }
 0x364   :  { %v388_v1 = vsel %vm224_vm6, %v1224_v60, 0.0  ;;  %v1226_v2 = vpop.eup %1225 }
 0x365   :  { %v319_v5 = vsel %vm224_vm6, %v1226_v2, 0.0 }
 0x39c   :  { %v284_v43 = vpop.f32.mrf.mxu3 }
 0x39d   :  { %287 = vst.msk [vmem:[#allocation2] sm:$0xff] %vm224_vm6, %v284_v43  ;;  %v645_v49 = vpop.f32.mrf.mxu0 }
 0x39e   :  { %v648_v52 = vmul.f32 0.35355338, %v645_v49 }
 0x3a0   :  { %v649_v58 = vsel %vm224_vm6, %v648_v52, -inf }
 0x3a4   :  { %v446_v45 = vpop.f32.mrf.mxu3 }
 0x3a5   :  { %v449_v46 = vmul.f32 0.35355338, %v446_v45 }
 0x3a7   :  { %v450_v48 = vsel %vm224_vm6, %v449_v46, -inf }
 0x3a8   :  { %451 = vmax.xlane.f32.xlu1 %v450_v48 }
 0x3ac   :  { %v514_v53 = vpop.f32.mrf.mxu3 }
 0x3ad   :  { %v517_v54 = vmul.f32 0.35355338, %v514_v53 }
 0x3af   :  { %v518_v56 = vsel %vm224_vm6, %v517_v54, -inf }
 0x3b0   :  { %519 = vmax.xlane.f32.xlu0 %v518_v56  ;;  %650 = vmax.xlane.f32.xlu1 %v649_v58 }
 0x3b4   :  { %v577_v61 = vpop.f32.mrf.mxu3 }
 0x3b5   :  { %v580_v62 = vmul.f32 0.35355338, %v577_v61 }
 0x3b7   :  { %v581_v63 = vsel %vm224_vm6, %v580_v62, -inf }
 0x3b8   :  { %582 = vmax.xlane.f32.xlu2 %v581_v63  ;;  %389 = vadd.xlane.f32.xlu1 %v388_v1  ;;  %v760_v63 = vld [vmem:[%s1722_s6 + $0x18] sm:$0xff]  ;;  %v759_v1 = vld [vmem:[%s1722_s6 + $0x10] sm:$0xff] }
 0x3b9   :  { %1152 = vmatpush.xpose.msk.msra.mxu0 %vm43_vm0, %v760_v63 }
 0x3bc   :  { %v712_v3 = vpop.f32.mrf.mxu3 }
 0x3bd   :  { %v715_v4 = vmul.f32 0.35355338, %v712_v3  ;;  %1153 = vmatpush.xpose.msk.msra.mxu0 %vm43_vm0, %v759_v1 }
 0x3bf   :  { %v716_v6 = vsel %vm224_vm6, %v715_v4, -inf }
 0x3c0   :  { %320 = vadd.xlane.f32.xlu2 %v319_v5  ;;  %717 = vmax.xlane.f32.xlu0 %v716_v6  ;;  %v758_v6 = vld [vmem:[%s1722_s6 + $0x8] sm:$0xff] }
 0x3c1   :  { %1154 = vmatpush.xpose.msk.msra.mxu0 %vm43_vm0, %v758_v6 }
 0x3d8   :  { %393 = vrot.lane.b32.xlu2 %v1462_v57, %s1300_s5 }
 0x3e0   :  { %660 = vrot.lane.b32.xlu2 %v1489_v16, %s1300_s5 }
 0x41b   :  { %v452_v7 = vpop.xlane.xlu1 %451 }
 0x41c   :  { %v453_v8 = vsub.f32 %v449_v46, %v452_v7  ;;  %v757_v7 = vld [vmem:[%s1722_s6] sm:$0xff] }
 0x41d   :  { %1155 = vmatpush.xpose.msk.msra.mxu0 %vm43_vm0, %v757_v7 }
 0x41e   :  { %v454_v9 = vmul.f32 1.442695, %v453_v8 }
 0x420   :  { %1227 = vpow2.f32 %v454_v9 }
 0x423   :  { %v520_v10 = vpop.xlane.xlu0 %519  ;;  %v651_v15 = vpop.xlane.xlu1 %650 }
 0x424   :  { %v521_v11 = vsub.f32 %v517_v54, %v520_v10  ;;  %v652_v20 = vsub.f32 %v648_v52, %v651_v15 }
 0x426   :  { %v1228_v12 = vpop.eup %1227  ;;  %v522_v13 = vmul.f32 1.442695, %v521_v11  ;;  %v653_v22 = vmul.f32 1.442695, %v652_v20  ;;  %v938_v20 = vld [vmem:[%s1725_s9 + $0x58] sm:$0xff] }
 0x427   :  { %v456_v14 = vsel %vm224_vm6, %v1228_v12, 0.0  ;;  %1172 = vmatpush.xpose.msk.msrb.mxu3 %vm43_vm0, %v938_v20  ;;  %v1040_v20 = vld [vmem:[%s1726_s10] sm:$0xff] }
 0x428   :  { %1229 = vpow2.f32 %v522_v13  ;;  %457 = vadd.xlane.f32.xlu0 %v456_v14 }
 0x42b   :  { %v583_v17 = vpop.xlane.xlu2 %582  ;;  %v390_v29 = vpop.xlane.xlu1 %389 }
 0x42c   :  { %v584_v18 = vsub.f32 %v580_v62, %v583_v17 }
 0x42e   :  { %v1230_v19 = vpop.eup %1229  ;;  %v585_v57 = vmul.f32 1.442695, %v584_v18 }
 0x42f   :  { %v524_v21 = vsel %vm224_vm6, %v1230_v19, 0.0 }
 0x430   :  { %1231 = vpow2.f32 %v585_v57  ;;  %525 = vadd.xlane.f32.xlu1 %v524_v21  ;;  %v937_v57 = vld [vmem:[%s1725_s9 + $0x50] sm:$0xff]  ;;  %v859_v21 = vld [vmem:[%s1724_s8 + $0x48] sm:$0xff] }
 0x431   :  { %1173 = vmatpush.xpose.msk.msrb.mxu3 %vm43_vm0, %v937_v57 }
 0x433   :  { %v718_v24 = vpop.xlane.xlu0 %717  ;;  %v321_v25 = vpop.xlane.xlu2 %320 }
 0x434   :  { %1233 = vrcp.f32 %v321_v25  ;;  %v719_v27 = vsub.f32 %v715_v4, %v718_v24 }
 0x435   :  { %1235 = vpow2.f32 %v653_v22  ;;  %v936_v22 = vld [vmem:[%s1725_s9 + $0x48] sm:$0xff] }
 0x436   :  { %v1232_v26 = vpop.eup %1231  ;;  %1237 = vrcp.f32 %v390_v29  ;;  %v720_v32 = vmul.f32 1.442695, %v719_v27  ;;  %1174 = vmatpush.xpose.msk.msrb.mxu3 %vm43_vm0, %v936_v22  ;;  %v858_v29 = vld [vmem:[%s1724_s8 + $0x40] sm:$0xff] }
 0x437   :  { %v587_v30 = vsel %vm224_vm6, %v1232_v26, 0.0 }
 0x438   :  { %588 = vadd.xlane.f32.xlu0 %v587_v30  ;;  %1239 = vpow2.f32 %v720_v32  ;;  %v935_v30 = vld [vmem:[%s1725_s9 + $0x40] sm:$0xff]  ;;  %v856_v32 = vld [vmem:[%s1724_s8 + $0x30] sm:$0xff] }
 0x43a   :  { %v1234_v31 = vpop.eup %1233  ;;  %1175 = vmatpush.xpose.msk.msrb.mxu3 %vm43_vm0, %v935_v30 }
 0x43b   :  { %v394_v33 = vpop.permute.xlu2 %393  ;;  %v323_v34 = vmul.f32 %v1234_v31, %v1226_v2  ;;  %v1236_v35 = vpop.eup %1235  ;;  %v934_v31 = vld [vmem:[%s1725_s9 + $0x38] sm:$0xff] }
 0x43c   :  { %414 = vmatpush.msra.mxu2 %v394_v33  ;;  %v655_v36 = vsel %vm224_vm6, %v1236_v35, 0.0  ;;  %v1238_v37 = vpop.eup %1237 }
 0x43d   :  { %1133 = vmatmul.msk.f32.vlgmr.msrb.gmra.mxu2 %vm224_vm6, %v323_v34  ;;  %v392_v38 = vmul.f32 %v1238_v37, %v1224_v60  ;;  %v855_v34 = vld [vmem:[%s1724_s8 + $0x28] sm:$0xff]  ;;  %v931_v37 = vld [vmem:[%s1725_s9 + $0x20] sm:$0xff] }
 0x43e   :  { %479 = vmatpush.msrb.mxu2 %v394_v33  ;;  %v1240_v39 = vpop.eup %1239  ;;  %1176 = vmatpush.xpose.msk.msrb.mxu3 %vm43_vm0, %v934_v31  ;;  %v933_v33 = vld [vmem:[%s1725_s9 + $0x30] sm:$0xff] }
 0x43f   :  { %v722_v40 = vsel %vm224_vm6, %v1240_v39, 0.0 }
 0x440   :  { %656 = vadd.xlane.f32.xlu0 %v655_v36  ;;  %v854_v36 = vld [vmem:[%s1724_s8 + $0x20] sm:$0xff] }
 0x442   :  { %1177 = vmatpush.xpose.msk.msrb.mxu3 %vm43_vm0, %v933_v33 }
 0x443   :  { %v661_v50 = vpop.permute.xlu2 %660 }
 0x445   :  { %1136 = vmatmul.msk.f32.vlgmr.msra.gmra.mxu2 %vm224_vm6, %v392_v38  ;;  %v853_v38 = vld [vmem:[%s1724_s8 + $0x18] sm:$0xff] }
 0x448   :  { %723 = vadd.xlane.f32.xlu0 %v722_v40  ;;  %v852_v40 = vld [vmem:[%s1724_s8 + $0x10] sm:$0xff] }
 0x449   :  { %529 = vrot.lane.b32.xlu1 %v1489_v16, %s1299_s4 }
 0x49b   :  { %v458_v41 = vpop.xlane.xlu0 %457 }
 0x49c   :  { %1241 = vrcp.f32 %v458_v41  ;;  %v929_v41 = vld [vmem:[%s1725_s9 + $0x10] sm:$0xff] }
 0x4a2   :  { %v1242_v42 = vpop.eup %1241 }
 0x4a3   :  { %v460_v43 = vmul.f32 %v1242_v42, %v1228_v12  ;;  %v526_v44 = vpop.xlane.xlu1 %525  ;;  %v851_v42 = vld [vmem:[%s1724_s8 + $0x8] sm:$0xff] }
 0x4a4   :  { %1243 = vrcp.f32 %v526_v44 }
 0x4a5   :  { %1139 = vmatmul.msk.f32.vlgmr.msrb.gmra.mxu2 %vm224_vm6, %v460_v43  ;;  %v928_v43 = vld [vmem:[%s1725_s9 + $0x8] sm:$0xff] }
 0x4aa   :  { %v1244_v46 = vpop.eup %1243 }
 0x4ab   :  { %v589_v45 = vpop.xlane.xlu0 %588  ;;  %v528_v47 = vmul.f32 %v1244_v46, %v1230_v19  ;;  %v861_v19 = vld [vmem:[%s1724_s8 + $0x58] sm:$0xff]  ;;  %v927_v46 = vld [vmem:[%s1725_s9] sm:$0xff] }
 0x4ac   :  { %1245 = vrcp.f32 %v589_v45  ;;  %1158 = vmatpush.xpose.msk.msrb.mxu1 %vm43_vm0, %v861_v19  ;;  %v850_v45 = vld [vmem:[%s1724_s8] sm:$0xff]  ;;  %v1041_v19 = vld [vmem:[%s1726_s10 + $0x8] sm:$0xff] }
 0x4b2   :  { %v1246_v16 = vpop.eup %1245 }
 0x4b3   :  { %v657_v49 = vpop.xlane.xlu0 %656  ;;  %v591_v52 = vmul.f32 %v1246_v16, %v1232_v26 }
 0x4b4   :  { %1247 = vrcp.f32 %v657_v49 }
 0x4ba   :  { %v1248_v54 = vpop.eup %1247 }
 0x4bb   :  { %v530_v48 = vpop.permute.xlu1 %529  ;;  %v724_v53 = vpop.xlane.xlu0 %723  ;;  %v659_v56 = vmul.f32 %v1248_v54, %v1236_v35  ;;  %v932_v35 = vld [vmem:[%s1725_s9 + $0x28] sm:$0xff] }
 0x4bc   :  { %550 = vmatpush.msra.mxu2 %v530_v48  ;;  %1249 = vrcp.f32 %v724_v53  ;;  %1178 = vmatpush.xpose.msk.msrb.mxu3 %vm43_vm0, %v932_v35 }
 0x4bd   :  { %1142 = vmatmul.msk.f32.vlgmr.msra.gmra.mxu2 %vm224_vm6, %v528_v47 }
 0x4be   :  { %610 = vmatpush.msrb.mxu2 %v530_v48 }
 0x4c0   :  { %681 = vmatpush.msra.mxu2 %v661_v50  ;;  %v344_v51 = vpop.f32.mrf.mxu2  ;;  %1179 = vmatpush.xpose.msk.msrb.mxu3 %vm43_vm0, %v931_v37 }
 0x4c1   :  { %348 = vrot.lane.b32.xlu0 %v344_v51, %s1301_s26 }
 0x4c2   :  { %v1250_v58 = vpop.eup %1249 }
 0x4c3   :  { %v726_v59 = vmul.f32 %v1250_v58, %v1240_v39  ;;  %v930_v39 = vld [vmem:[%s1725_s9 + $0x18] sm:$0xff] }
 0x4c4   :  { %1180 = vmatpush.xpose.msk.msrb.mxu3 %vm43_vm0, %v930_v39 }
 0x4c5   :  { %1145 = vmatmul.msk.f32.vlgmr.msrb.gmra.mxu2 %vm224_vm6, %v591_v52 }
 0x4c6   :  { %745 = vmatpush.msrb.mxu2 %v661_v50 }
 0x4c8   :  { %v416_v55 = vpop.f32.mrf.mxu2  ;;  %1181 = vmatpush.xpose.msk.msrb.mxu3 %vm43_vm0, %v929_v41 }
 0x4c9   :  { %420 = vrot.lane.b32.xlu2 %v416_v55, %s1302_s27 }
 0x4cc   :  { %1182 = vmatpush.xpose.msk.msrb.mxu3 %vm43_vm0, %v928_v43 }
 0x4cd   :  { %1148 = vmatmul.msk.f32.vlgmr.msra.gmra.mxu2 %vm224_vm6, %v659_v56 }
 0x4d0   :  { %1183 = vmatpush.xpose.msk.msrb.mxu3 %vm43_vm0, %v927_v46 }
 0x4d5   :  { %1151 = vmatmul.msk.f32.vlgmr.msrb.gmra.mxu2 %vm224_vm6, %v726_v59  ;;  %v1208_v59 = vld [vmem:[%s1723_s7] ss:$0 sm:$0xff] }
 0x523   :  { %v421_v62 = vpop.permute.xlu2 %420 }
 0x528   :  { %v481_v60 = vpop.f32.mrf.mxu2 }
 0x529   :  { %485 = vrot.lane.b32.xlu1 %v481_v60, %s1303_s28 }
 0x533   :  { %v349_v61 = vpop.permute.xlu0 %348 }
 0x534   :  { %352 = vst.msk [vmem:[#allocation2] sm:$0xff] %vm351_vm7, %v349_v61 }
 0x535   :  { %424 = vst.msk [vmem:[#allocation2] sm:$0xff] %vm423_vm8, %v421_v62 }
 0x540   :  { %v552_v2 = vpop.f32.mrf.mxu2 }
 0x541   :  { %555 = vst.msk [vmem:[#allocation2 + $0x8] sm:$0xff] %vm224_vm6, %v552_v2 }
 0x548   :  { %v612_v3 = vpop.f32.mrf.mxu2 }
 0x549   :  { %616 = vrot.lane.b32.xlu2 %v612_v3, %s1301_s26 }
 0x550   :  { %v683_v4 = vpop.f32.mrf.mxu2 }
 0x551   :  { %687 = vrot.lane.b32.xlu1 %v683_v4, %s1302_s27 }
 0x558   :  { %v747_v5 = vpop.f32.mrf.mxu2 }
 0x559   :  { %751 = vrot.lane.b32.xlu2 %v747_v5, %s1303_s28 }
 0x59b   :  { %v486_v8 = vpop.permute.xlu1 %485 }
 0x59c   :  { %489 = vst.msk [vmem:[#allocation2] sm:$0xff] %vm488_vm9, %v486_v8 }
 0x5a3   :  { %v617_v9 = vpop.permute.xlu2 %616  ;;  %v755_v10 = vld [vmem:[#allocation2] sm:$0xff] }
 0x5a4   :  { %619 = vst.msk [vmem:[#allocation2 + $0x8] sm:$0xff] %vm351_vm7, %v617_v9  ;;  %1156 = vmatmul.msk.f32.vlgmr.msra.gmra.mxu0 %vm43_vm0, %v755_v10 }
 0x5b3   :  { %v752_v12 = vpop.permute.xlu2 %751 }
 0x5c3   :  { %v688_v11 = vpop.permute.xlu1 %687 }
 0x5c4   :  { %690 = vst.msk [vmem:[#allocation2 + $0x8] sm:$0xff] %vm423_vm8, %v688_v11 }
 0x5c5   :  { %754 = vst.msk [vmem:[#allocation2 + $0x8] sm:$0xff] %vm488_vm9, %v752_v12 }
 0x5cc   :  { %v756_v13 = vld [vmem:[#allocation2 + $0x8] sm:$0xff] }
 0x5cd   :  { %1157 = vmatmul.msk.f32.gmra.mxu0 %vm43_vm0, %v756_v13 }
 0x621   :  { %v796_v14 = vpop.f32.mrf.mxu0 }
 0x622   :  { %v1572_v15 = vadd.f32 %v796_v14, %v1369_v0  ;;  %v860_v0 = vld [vmem:[%s1724_s8 + $0x50] sm:$0xff] }
 0x623   :  { %1159 = vmatpush.xpose.msk.msrb.mxu1 %vm43_vm0, %v860_v0 }
 0x624   :  { %v804_v17 = vmul.f32 %v1572_v15, %v1572_v15 }
 0x626   :  { %v806_v18 = vsel %vm43_vm0, %v804_v17, 0.0 }
 0x627   :  { %807 = vadd.xlane.f32.xlu0 %v806_v18  ;;  %1160 = vmatpush.xpose.msk.msrb.mxu1 %vm43_vm0, %v859_v21  ;;  %v1042_v18 = vld [vmem:[%s1726_s10 + $0x10] sm:$0xff] }
 0x62b   :  { %1161 = vmatpush.xpose.msk.msrb.mxu1 %vm43_vm0, %v858_v29 }
 0x64a   :  { %v799_v24 = vpop.f32.mrf.mxu0 }
 0x64b   :  { %v1602_v25 = vadd.f32 %v799_v24, %v1444_v28  ;;  %v857_v28 = vld [vmem:[%s1724_s8 + $0x38] sm:$0xff] }
 0x64c   :  { %1162 = vmatpush.xpose.msk.msrb.mxu1 %vm43_vm0, %v857_v28 }
 0x64d   :  { %v805_v26 = vmul.f32 %v1602_v25, %v1602_v25 }
 0x64f   :  { %v809_v27 = vsel %vm43_vm0, %v805_v26, 0.0 }
 0x650   :  { %810 = vadd.xlane.f32.xlu1 %v809_v27  ;;  %1163 = vmatpush.xpose.msk.msrb.mxu1 %vm43_vm0, %v856_v32 }
 0x654   :  { %1164 = vmatpush.xpose.msk.msrb.mxu1 %vm43_vm0, %v855_v34 }
 0x658   :  { %1165 = vmatpush.xpose.msk.msrb.mxu1 %vm43_vm0, %v854_v36 }
 0x65c   :  { %1166 = vmatpush.xpose.msk.msrb.mxu1 %vm43_vm0, %v853_v38 }
 0x660   :  { %1167 = vmatpush.xpose.msk.msrb.mxu1 %vm43_vm0, %v852_v40 }
 0x664   :  { %1168 = vmatpush.xpose.msk.msrb.mxu1 %vm43_vm0, %v851_v42 }
 0x668   :  { %1169 = vmatpush.xpose.msk.msrb.mxu1 %vm43_vm0, %v850_v45 }
 0x69a   :  { %v808_v44 = vpop.xlane.xlu0 %807 }
 0x69b   :  { %v812_v47 = vmul.f32 %v808_v44, %v1428_v23 }
 0x69d   :  { %1251 = vrsqrt.f32 %v812_v47  ;;  %vm821_vm10 = vcmp.eq.f32.partialorder %v812_v47, inf  ;;  %v824_v54 = vand.u32 2147483648, %v812_v47  ;;  %vm823_vm11 = vcmp.eq.f32.partialorder %v812_v47, 0.0 }
 0x6a3   :  { %v1252_v48 = vpop.eup %1251 }
 0x6a4   :  { %v815_v49 = vmul.f32 %v1252_v48, %v812_v47 }
 0x6a6   :  { %v816_v50 = vmul.f32 %v1252_v48, %v815_v49 }
 0x6a8   :  { %v817_v16 = vmul.f32 0.5, %v816_v50 }
 0x6aa   :  { %v818_v51 = vsub.f32 1.5, %v817_v16 }
 0x6ac   :  { %v819_v52 = vmul.f32 %v1252_v48, %v818_v51 }
 0x6ae   :  { %v820_v53 = vmul.f32 %v819_v52, %v812_v47 }
 0x6b0   :  { %v822_v55 = vsel %vm821_vm10, %v812_v47, %v820_v53 }
 0x6b1   :  { %v825_v56 = vsel %vm823_vm11, %v824_v54, %v822_v55 }
 0x6b2   :  { %v838_v58 = vadd.f32 1e-06, %v825_v56 }
 0x6b4   :  { %1253 = vrcp.f32 %v838_v58 }
 0x6ba   :  { %v1254_v60 = vpop.eup %1253 }
 0x6bb   :  { %v842_v61 = vmul.f32 %v1254_v60, %v1572_v15 }
 0x6bd   :  { %v848_v62 = vmul.f32 %v1208_v59, %v842_v61 }
 0x6bf   :  { %1170 = vmatmul.msk.f32.vlgmr.msrb.gmra.mxu1 %vm43_vm0, %v848_v62  ;;  %1184 = vmatmul.msk.f32.vlgmr.msrb.gmra.mxu3 %vm43_vm0, %v848_v62 }
 0x6c3   :  { %v811_v63 = vpop.xlane.xlu1 %810 }
 0x6c4   :  { %v813_v1 = vmul.f32 %v811_v63, %v1428_v23  ;;  %v1043_v23 = vld [vmem:[%s1726_s10 + $0x18] sm:$0xff]  ;;  %s1304_s10 = smov [#allocation3]  }
 0x6c5   :  { %1188 = vmatpush.xpose.msk.msra.mxu2 %vm1044_vm14, %v1043_v23  ;;  %s1094_s18 = sshll.u32 %s1304_s10, 4  ;;  %s1095_s18 = int_to_ptr.vmem [resolvable:$true] %s1094_s18 }
 0x6c6   :  { %1255 = vrsqrt.f32 %v813_v1  ;;  %vm833_vm12 = vcmp.eq.f32.partialorder %v813_v1, inf  ;;  %v836_v9 = vand.u32 2147483648, %v813_v1  ;;  %vm835_vm13 = vcmp.eq.f32.partialorder %v813_v1, 0.0 }
 0x6c9   :  { %1189 = vmatpush.xpose.msk.msra.mxu2 %vm1044_vm14, %v1042_v18 }
 0x6cc   :  { %v1256_v2 = vpop.eup %1255 }
 0x6cd   :  { %v827_v3 = vmul.f32 %v1256_v2, %v813_v1  ;;  %1190 = vmatpush.xpose.msk.msra.mxu2 %vm1044_vm14, %v1041_v19 }
 0x6cf   :  { %v828_v4 = vmul.f32 %v1256_v2, %v827_v3 }
 0x6d1   :  { %v829_v5 = vmul.f32 0.5, %v828_v4  ;;  %1191 = vmatpush.xpose.msk.msra.mxu2 %vm1044_vm14, %v1040_v20 }
 0x6d3   :  { %v830_v6 = vsub.f32 1.5, %v829_v5 }
 0x6d5   :  { %v831_v7 = vmul.f32 %v1256_v2, %v830_v6 }
 0x6d7   :  { %v832_v8 = vmul.f32 %v831_v7, %v813_v1 }
 0x6d9   :  { %v834_v10 = vsel %vm833_vm12, %v813_v1, %v832_v8 }
 0x6da   :  { %v837_v11 = vsel %vm835_vm13, %v836_v9, %v834_v10 }
 0x6db   :  { %v839_v12 = vadd.f32 1e-06, %v837_v11 }
 0x6dd   :  { %1257 = vrcp.f32 %v839_v12 }
 0x6e3   :  { %v1258_v13 = vpop.eup %1257 }
 0x6e4   :  { %v843_v14 = vmul.f32 %v1258_v13, %v1602_v25 }
 0x6e6   :  { %v849_v17 = vmul.f32 %v1208_v59, %v843_v14 }
 0x6e8   :  { %1171 = vmatmul.msk.f32.gmra.mxu1 %vm43_vm0, %v849_v17  ;;  %1185 = vmatmul.msk.f32.gmra.mxu3 %vm43_vm0, %v849_v17 }
 0x73c   :  { %v921_v0 = vpop.f32.mrf.mxu1 }
 0x73d   :  { %v1186_v57 = vmul.f32 -1.442695, %v921_v0 }
 0x73f   :  { %1259 = vpow2.f32 %v1186_v57 }
 0x742   :  { %v992_v36 = vpop.f32.mrf.mxu3 }
 0x745   :  { %v1260_v21 = vpop.eup %1259 }
 0x746   :  { %v1004_v22 = vadd.f32 1.0, %v1260_v21 }
 0x748   :  { %1261 = vrcp.f32 %v1004_v22  ;;  %v1017_v29 = vand.u32 2147483648, %v1004_v22  ;;  %v1015_v28 = vand.u32 2147483647, %v1004_v22  ;;  %vm1011_vm1 = vweird.f32 %v1004_v22 }
 0x74a   :  { %v1018_v32 = vor.u32 1.1754944e-38, %v1017_v29  ;;  %vm1016_vm3 = vcmp.eq.f32.partialorder %v1015_v28, 8.507059e+37 }
 0x74e   :  { %v1262_v24 = vpop.eup %1261 }
 0x74f   :  { %v1007_v26 = vmul.f32 %v1262_v24, %v1004_v22  ;;  %vm1012_vm15 = vweird.f32 %v1262_v24 }
 0x750   :  { %vm1013_vm2 = vmor %vm1011_vm1, %vm1012_vm15 }
 0x751   :  { %v1008_v27 = vsub.f32 1.0, %v1007_v26 }
 0x753   :  { %v1009_v30 = vmul.f32 %v1262_v24, %v1008_v27 }
 0x755   :  { %v1010_v31 = vadd.f32 %v1262_v24, %v1009_v30 }
 0x757   :  { %v1014_v33 = vsel %vm1013_vm2, %v1262_v24, %v1010_v31 }
 0x758   :  { %v1019_v34 = vsel %vm1016_vm3, %v1018_v32, %v1014_v33 }
 0x759   :  { %v1036_v35 = vmul.f32 %v1019_v34, %v921_v0 }
 0x75b   :  { %v1038_v37 = vmul.f32 %v1036_v35, %v992_v36 }
 0x75d   :  { %1192 = vmatmul.msk.f32.vlgmr.msra.gmra.mxu2 %vm1044_vm14, %v1038_v37 }
 0x765   :  { %v924_v38 = vpop.f32.mrf.mxu1 }
 0x766   :  { %v1187_v39 = vmul.f32 -1.442695, %v924_v38 }
 0x768   :  { %1263 = vpow2.f32 %v1187_v39 }
 0x76b   :  { %v995_v52 = vpop.f32.mrf.mxu3 }
 0x76e   :  { %v1264_v40 = vpop.eup %1263 }
 0x76f   :  { %v1005_v41 = vadd.f32 1.0, %v1264_v40 }
 0x771   :  { %1265 = vrcp.f32 %v1005_v41  ;;  %v1032_v45 = vand.u32 2147483648, %v1005_v41  ;;  %v1030_v47 = vand.u32 2147483647, %v1005_v41  ;;  %vm1026_vm5 = vweird.f32 %v1005_v41 }
 0x773   :  { %v1033_v49 = vor.u32 1.1754944e-38, %v1032_v45  ;;  %vm1031_vm7 = vcmp.eq.f32.partialorder %v1030_v47, 8.507059e+37 }
 0x777   :  { %v1266_v42 = vpop.eup %1265 }
 0x778   :  { %v1022_v43 = vmul.f32 %v1266_v42, %v1005_v41  ;;  %vm1027_vm4 = vweird.f32 %v1266_v42 }
 0x779   :  { %vm1028_vm6 = vmor %vm1026_vm5, %vm1027_vm4 }
 0x77a   :  { %v1023_v44 = vsub.f32 1.0, %v1022_v43 }
 0x77c   :  { %v1024_v46 = vmul.f32 %v1266_v42, %v1023_v44 }
 0x77e   :  { %v1025_v48 = vadd.f32 %v1266_v42, %v1024_v46 }
 0x780   :  { %v1029_v50 = vsel %vm1028_vm6, %v1266_v42, %v1025_v48 }
 0x781   :  { %v1034_v16 = vsel %vm1031_vm7, %v1033_v49, %v1029_v50 }
 0x782   :  { %v1037_v51 = vmul.f32 %v1034_v16, %v924_v38 }
 0x784   :  { %v1039_v53 = vmul.f32 %v1037_v51, %v995_v52 }
 0x786   :  { %1193 = vmatmul.msk.f32.gmra.mxu2 %vm1044_vm14, %v1039_v53 }
 0x7e0   :  { %v1080_v54 = vpop.f32.mrf.mxu2 }
 0x7e1   :  { %v1086_v55 = vadd.f32 %v1080_v54, %v1572_v15 }
 0x7e3   :  { %1088 = vst.msk [vmem:[#allocation3] sm:$0xff] %vm43_vm0, %v1086_v55 }
 0x809   :  { %v1083_v56 = vpop.f32.mrf.mxu2 }
 0x80a   :  { %v1087_v58 = vadd.f32 %v1083_v56, %v1602_v25 }
 0x80c   :  { %1089 = vst.msk [vmem:[#allocation3 + $0x8] sm:$0xff] %vm43_vm0, %v1087_v58 }
 0x80d   :  { %1102 = dma.vmem_to_hbm [thread:$0]  %s1095_s18, 256, %s1097_s21, [#allocation4], %s1305_s22, %s1305_s22, %s1301_s26  }
 0x80e   :  { %1291 = dma.done.wait [#allocation4], 256  }
 0x80f   :  { %1292 = vsyncadd [#allocation4], 4294967040 }
 0x810   :  { %1107 = vsyncpa [#allocation4], 1 }

</bundles_post_ra>
